<compile_context>
chip_gen: v7x
topology: tpu7x:2x2x1
jax: 0.10.0
libtpu: 0.0.40
codegen_flags: <defaults>
</compile_context>

<pallas_src>
import functools

import jax
import jax.numpy as jnp
from jax.experimental import pallas as pl
from jax.experimental.pallas import tpu as pltpu


def _cross_attn_kernel(x_ref,
                       wd1_ref, bd1_ref, wd2_ref, bd2_ref, wd3_ref, bd3_ref,
                       wl1_ref, bl1_ref, wl2_ref, bl2_ref, wl3_ref, bl3_ref,
                       out_ref, attnl_t_ref, *, matmul_dtype):
    TB, N, C = x_ref.shape

    x3 = x_ref[...]                                   # (TB, N, C)
    xd = x3.reshape(TB * N, C)                        # flattened D-branch slab

    def mm(a, w_ref):
        # Optionally down-cast MXU operands (bf16 on v6e/v7x); accumulate f32.
        w = w_ref[...]
        if matmul_dtype is not None:
            a = a.astype(matmul_dtype)
            w = w.astype(matmul_dtype)
        return jnp.dot(a, w, preferred_element_type=jnp.float32)

    # ---- D branch: Linear(C, C/2) Tanh Linear(C/2, C) Tanh Linear(C, C) Sigmoid
    h = jnp.tanh(mm(xd, wd1_ref) + bd1_ref[...])
    h = jnp.tanh(mm(h, wd2_ref) + bd2_ref[...])
    attn_d = jax.nn.sigmoid(mm(h, wd3_ref) + bd3_ref[...])            # (TB*N, C)

    # ---- L branch: Linear(N, N/2) Tanh Linear(N/2, N) Tanh Linear(N, N) Sigmoid
    # one batched minor-dim transpose, then a single (TB*C, N) slab.
    xl = jnp.transpose(x3, (0, 2, 1)).reshape(TB * C, N)
    g = jnp.tanh(mm(xl, wl1_ref) + bl1_ref[...])
    g = jnp.tanh(mm(g, wl2_ref) + bl2_ref[...])
    attn_l = jax.nn.sigmoid(mm(g, wl3_ref) + bl3_ref[...])            # (TB*C, N)

    attn_l_t = jnp.transpose(attn_l.reshape(TB, C, N), (0, 2, 1))     # (TB, N, C)

    # ---- fused gating: x*attnD + (x^T*attnL)^T == x * (attnD + attnL^T)
    out = x3 * (attn_d.reshape(TB, N, C) + attn_l_t)

    out_ref[...] = out.astype(out_ref.dtype)
    attnl_t_ref[...] = attn_l_t.astype(attnl_t_ref.dtype)             # lane-dense store


def cross_attention6_plot(x, params, *, batch_tile=256, matmul_dtype=None):
    """x: (Bn, Mh, Mw, C).  Returns (out (Bn,Mh,Mw,C), attnL (Bn,C,N))."""
    Bn, Mh, Mw, C = x.shape
    N = Mh * Mw
    x_flat = x.reshape(Bn, N, C)

    (wd1, bd1, wd2, bd2, wd3, bd3,
     wl1, bl1, wl2, bl2, wl3, bl3) = params

    # ---- choose the per-step batch tile TB -------------------------------
    # keep the three (TB, N, C) blocks (x, out, attnL^T), double-buffered,
    # within a conservative VMEM budget that also fits v7x (64 MiB physical).
    elem_bytes = N * C * jnp.dtype(x.dtype).itemsize
    vmem_budget = 16 * 1024 * 1024
    max_tb = max(1, vmem_budget // (6 * elem_bytes))
    tb = max(1, min(batch_tile, Bn, max_tb))
    while Bn % tb:
        tb -= 1
    # if the whole batch fits in one large step, optionally split in two so a
    # parallel grid axis can be sharded across v7x's two TensorCores.
    if Bn // tb == 1 and Bn >= 128 and Bn % 2 == 0:
        tb = Bn // 2
        while Bn % tb:
            tb -= 1

    full = lambda arr: pl.BlockSpec(arr.shape, lambda b: (0,) * arr.ndim)

    grid_spec = pltpu.PrefetchScalarGridSpec(
        num_scalar_prefetch=0,
        grid=(Bn // tb,),
        in_specs=[
            pl.BlockSpec((tb, N, C), lambda b: (b, 0, 0)),
            full(wd1), full(bd1), full(wd2), full(bd2), full(wd3), full(bd3),
            full(wl1), full(bl1), full(wl2), full(bl2), full(wl3), full(bl3),
        ],
        out_specs=[
            pl.BlockSpec((tb, N, C), lambda b: (b, 0, 0)),
            pl.BlockSpec((tb, N, C), lambda b: (b, 0, 0)),
        ],
    )

    kernel = functools.partial(_cross_attn_kernel, matmul_dtype=matmul_dtype)

    out_flat, attn_l_t = pl.pallas_call(
        kernel,
        out_shape=(
            jax.ShapeDtypeStruct((Bn, N, C), x.dtype),
            jax.ShapeDtypeStruct((Bn, N, C), x.dtype),
        ),
        grid_spec=grid_spec,
        compiler_params=pltpu.CompilerParams(
            dimension_semantics=("parallel",),
            vmem_limit_bytes=32 * 1024 * 1024),
    )(x_flat, wd1, bd1, wd2, bd2, wd3, bd3,
      wl1, bl1, wl2, bl2, wl3, bl3)

    # module returns attnL in (Bn, C, N); transpose the lane-dense kernel output.
    attn_l = jnp.transpose(attn_l_t, (0, 2, 1))
    return out_flat.reshape(Bn, Mh, Mw, C), attn_l


def init_params(key, dim, window_size):
    """Weights stored as (in, out) so the kernel does x @ W + b
    (== PyTorch x @ W.T + b with W of shape (out, in)).  Biases (1, out)."""
    C, L = dim, window_size
    keys = jax.random.split(key, 6)
    s = 0.1

    wd1 = s * jax.random.normal(keys[0], (C, C // 2), jnp.float32)
    wd2 = s * jax.random.normal(keys[1], (C // 2, C), jnp.float32)
    wd3 = s * jax.random.normal(keys[2], (C, C), jnp.float32)
    bd1 = jnp.zeros((1, C // 2), jnp.float32)
    bd2 = jnp.zeros((1, C), jnp.float32)
    bd3 = jnp.zeros((1, C), jnp.float32)

    wl1 = s * jax.random.normal(keys[3], (L, L // 2), jnp.float32)
    wl2 = s * jax.random.normal(keys[4], (L // 2, L), jnp.float32)
    wl3 = s * jax.random.normal(keys[5], (L, L), jnp.float32)
    bl1 = jnp.zeros((1, L // 2), jnp.float32)
    bl2 = jnp.zeros((1, L), jnp.float32)
    bl3 = jnp.zeros((1, L), jnp.float32)

    return (wd1, bd1, wd2, bd2, wd3, bd3, wl1, bl1, wl2, bl2, wl3, bl3)


def reference(x, params):
    """Pure-JAX reference mirroring the PyTorch forward (eval mode, drop=0)."""
    (wd1, bd1, wd2, bd2, wd3, bd3, wl1, bl1, wl2, bl2, wl3, bl3) = params
    Bn, Mh, Mw, C = x.shape
    N = Mh * Mw
    xD = x.reshape(Bn, N, C)
    xL = jnp.transpose(xD, (0, 2, 1))                  # (Bn, C, N)

    h = jnp.tanh(xD @ wd1 + bd1)
    h = jnp.tanh(h @ wd2 + bd2)
    attnD = jax.nn.sigmoid(h @ wd3 + bd3)

    g = jnp.tanh(xL @ wl1 + bl1)
    g = jnp.tanh(g @ wl2 + bl2)
    attnL = jax.nn.sigmoid(g @ wl3 + bl3)

    xDg = xD * attnD
    xLg = xL * attnL
    xLb = jnp.transpose(xLg, (0, 2, 1)).reshape(Bn, Mh, Mw, C)
    xDb = xDg.reshape(Bn, Mh, Mw, C)
    return xDb + xLb, attnL


if __name__ == "__main__":
    # Small shapes consistent with the module: dim=C=32, window_size=Mh*Mw=16.
    Bn, Mh, Mw, C = 8, 4, 4, 32
    L = Mh * Mw  # window_size (Llinear acts on the Mh*Mw axis)

    key = jax.random.PRNGKey(0)
    kx, kp = jax.random.split(key)
    x = jax.random.normal(kx, (Bn, Mh, Mw, C), jnp.float32)
    params = init_params(kp, dim=C, window_size=L)

    out, attn_l = cross_attention6_plot(x, params)
    out = jax.block_until_ready(out)
    attn_l = jax.block_until_ready(attn_l)

    ref_out, ref_attn_l = reference(x, params)
    assert out.shape == (Bn, Mh, Mw, C)
    assert attn_l.shape == (Bn, C, L)
    assert jnp.allclose(out, ref_out, atol=1e-5, rtol=1e-5)
    assert jnp.allclose(attn_l, ref_attn_l, atol=1e-5, rtol=1e-5)

    print("KERNEL_OK")
</pallas_src>

<mosaic_0001>
module attributes {stable_mosaic.version = 11 : i64} {
  func.func @_cross_attn_kernel(%arg0: i32, %arg1: memref<8x16x32xf32, #tpu.memory_space<vmem>>, %arg2: memref<32x16xf32, #tpu.memory_space<vmem>>, %arg3: memref<1x16xf32, #tpu.memory_space<vmem>>, %arg4: memref<16x32xf32, #tpu.memory_space<vmem>>, %arg5: memref<1x32xf32, #tpu.memory_space<vmem>>, %arg6: memref<32x32xf32, #tpu.memory_space<vmem>>, %arg7: memref<1x32xf32, #tpu.memory_space<vmem>>, %arg8: memref<16x8xf32, #tpu.memory_space<vmem>>, %arg9: memref<1x8xf32, #tpu.memory_space<vmem>>, %arg10: memref<8x16xf32, #tpu.memory_space<vmem>>, %arg11: memref<1x16xf32, #tpu.memory_space<vmem>>, %arg12: memref<16x16xf32, #tpu.memory_space<vmem>>, %arg13: memref<1x16xf32, #tpu.memory_space<vmem>>, %arg14: memref<8x16x32xf32, #tpu.memory_space<vmem>>, %arg15: memref<8x16x32xf32, #tpu.memory_space<vmem>>) attributes {dimension_semantics = [#tpu.dimension_semantics<parallel>], iteration_bounds = array<i64: 1>, scalar_prefetch = 0 : i64, scratch_operands = 0 : i64, tpu.core_type = #tpu.core_type<tc>, window_params = [{transform_indices = @transform_0, window_bounds = array<i64: 8, 16, 32>}, {pipeline_mode = #tpu.pipeline_mode<synchronous>, transform_indices = @transform_1, window_bounds = array<i64: 32, 16>}, {pipeline_mode = #tpu.pipeline_mode<synchronous>, transform_indices = @transform_2, window_bounds = array<i64: 1, 16>}, {pipeline_mode = #tpu.pipeline_mode<synchronous>, transform_indices = @transform_3, window_bounds = array<i64: 16, 32>}, {pipeline_mode = #tpu.pipeline_mode<synchronous>, transform_indices = @transform_4, window_bounds = array<i64: 1, 32>}, {pipeline_mode = #tpu.pipeline_mode<synchronous>, transform_indices = @transform_5, window_bounds = array<i64: 32, 32>}, {pipeline_mode = #tpu.pipeline_mode<synchronous>, transform_indices = @transform_6, window_bounds = array<i64: 1, 32>}, {pipeline_mode = #tpu.pipeline_mode<synchronous>, transform_indices = @transform_7, window_bounds = array<i64: 16, 8>}, {pipeline_mode = #tpu.pipeline_mode<synchronous>, transform_indices = @transform_8, window_bounds = array<i64: 1, 8>}, {pipeline_mode = #tpu.pipeline_mode<synchronous>, transform_indices = @transform_9, window_bounds = array<i64: 8, 16>}, {pipeline_mode = #tpu.pipeline_mode<synchronous>, transform_indices = @transform_10, window_bounds = array<i64: 1, 16>}, {pipeline_mode = #tpu.pipeline_mode<synchronous>, transform_indices = @transform_11, window_bounds = array<i64: 16, 16>}, {pipeline_mode = #tpu.pipeline_mode<synchronous>, transform_indices = @transform_12, window_bounds = array<i64: 1, 16>}, {transform_indices = @transform_13, window_bounds = array<i64: 8, 16, 32>}, {transform_indices = @transform_14, window_bounds = array<i64: 8, 16, 32>}]} {
    %c0 = arith.constant 0 : index
    %c0_0 = arith.constant 0 : index
    %c0_1 = arith.constant 0 : index
    %0 = vector.load %arg1[%c0, %c0_0, %c0_1] : memref<8x16x32xf32, #tpu.memory_space<vmem>>, vector<8x16x32xf32>
    %1 = vector.shape_cast %0 : vector<8x16x32xf32> to vector<128x32xf32>
    %c0_2 = arith.constant 0 : index
    %c0_3 = arith.constant 0 : index
    %2 = vector.load %arg2[%c0_2, %c0_3] : memref<32x16xf32, #tpu.memory_space<vmem>>, vector<32x16xf32>
    %cst = arith.constant dense<0.000000e+00> : vector<128x16xf32>
    %3 = tpu.matmul %1, %2, %cst {dimension_numbers = #tpu.dot_dimension_numbers<[1], [0], [0], [1], [0, 0, 1, 1], [], []>} : vector<128x32xf32>, vector<32x16xf32>, vector<128x16xf32> -> vector<128x16xf32>
    %c0_4 = arith.constant 0 : index
    %c0_5 = arith.constant 0 : index
    %4 = vector.load %arg3[%c0_4, %c0_5] : memref<1x16xf32, #tpu.memory_space<vmem>>, vector<1x16xf32>
    %5 = vector.broadcast %4 : vector<1x16xf32> to vector<128x16xf32>
    %6 = arith.addf %3, %5 : vector<128x16xf32>
    %7 = math.tanh %6 : vector<128x16xf32>
    %c0_6 = arith.constant 0 : index
    %c0_7 = arith.constant 0 : index
    %8 = vector.load %arg4[%c0_6, %c0_7] : memref<16x32xf32, #tpu.memory_space<vmem>>, vector<16x32xf32>
    %cst_8 = arith.constant dense<0.000000e+00> : vector<128x32xf32>
    %9 = tpu.matmul %7, %8, %cst_8 {dimension_numbers = #tpu.dot_dimension_numbers<[1], [0], [0], [1], [0, 0, 1, 1], [], []>} : vector<128x16xf32>, vector<16x32xf32>, vector<128x32xf32> -> vector<128x32xf32>
    %c0_9 = arith.constant 0 : index
    %c0_10 = arith.constant 0 : index
    %10 = vector.load %arg5[%c0_9, %c0_10] : memref<1x32xf32, #tpu.memory_space<vmem>>, vector<1x32xf32>
    %11 = vector.broadcast %10 : vector<1x32xf32> to vector<128x32xf32>
    %12 = arith.addf %9, %11 : vector<128x32xf32>
    %13 = math.tanh %12 : vector<128x32xf32>
    %c0_11 = arith.constant 0 : index
    %c0_12 = arith.constant 0 : index
    %14 = vector.load %arg6[%c0_11, %c0_12] : memref<32x32xf32, #tpu.memory_space<vmem>>, vector<32x32xf32>
    %cst_13 = arith.constant dense<0.000000e+00> : vector<128x32xf32>
    %15 = tpu.matmul %13, %14, %cst_13 {dimension_numbers = #tpu.dot_dimension_numbers<[1], [0], [0], [1], [0, 0, 1, 1], [], []>} : vector<128x32xf32>, vector<32x32xf32>, vector<128x32xf32> -> vector<128x32xf32>
    %c0_14 = arith.constant 0 : index
    %c0_15 = arith.constant 0 : index
    %16 = vector.load %arg7[%c0_14, %c0_15] : memref<1x32xf32, #tpu.memory_space<vmem>>, vector<1x32xf32>
    %17 = vector.broadcast %16 : vector<1x32xf32> to vector<128x32xf32>
    %18 = arith.addf %15, %17 : vector<128x32xf32>
    %19 = arith.negf %18 : vector<128x32xf32>
    %20 = math.exp %19 : vector<128x32xf32>
    %cst_16 = arith.constant 1.000000e+00 : f32
    %21 = vector.broadcast %cst_16 : f32 to vector<128x32xf32>
    %22 = arith.addf %21, %20 : vector<128x32xf32>
    %23 = arith.divf %21, %22 : vector<128x32xf32>
    %24 = tpu.transpose %0, [0, 2, 1] : vector<8x16x32xf32> -> vector<8x32x16xf32>
    %25 = vector.shape_cast %24 : vector<8x32x16xf32> to vector<256x16xf32>
    %c0_17 = arith.constant 0 : index
    %c0_18 = arith.constant 0 : index
    %26 = vector.load %arg8[%c0_17, %c0_18] : memref<16x8xf32, #tpu.memory_space<vmem>>, vector<16x8xf32>
    %cst_19 = arith.constant dense<0.000000e+00> : vector<256x8xf32>
    %27 = tpu.matmul %25, %26, %cst_19 {dimension_numbers = #tpu.dot_dimension_numbers<[1], [0], [0], [1], [0, 0, 1, 1], [], []>} : vector<256x16xf32>, vector<16x8xf32>, vector<256x8xf32> -> vector<256x8xf32>
    %c0_20 = arith.constant 0 : index
    %c0_21 = arith.constant 0 : index
    %28 = vector.load %arg9[%c0_20, %c0_21] : memref<1x8xf32, #tpu.memory_space<vmem>>, vector<1x8xf32>
    %29 = vector.broadcast %28 : vector<1x8xf32> to vector<256x8xf32>
    %30 = arith.addf %27, %29 : vector<256x8xf32>
    %31 = math.tanh %30 : vector<256x8xf32>
    %c0_22 = arith.constant 0 : index
    %c0_23 = arith.constant 0 : index
    %32 = vector.load %arg10[%c0_22, %c0_23] : memref<8x16xf32, #tpu.memory_space<vmem>>, vector<8x16xf32>
    %cst_24 = arith.constant dense<0.000000e+00> : vector<256x16xf32>
    %33 = tpu.matmul %31, %32, %cst_24 {dimension_numbers = #tpu.dot_dimension_numbers<[1], [0], [0], [1], [0, 0, 1, 1], [], []>} : vector<256x8xf32>, vector<8x16xf32>, vector<256x16xf32> -> vector<256x16xf32>
    %c0_25 = arith.constant 0 : index
    %c0_26 = arith.constant 0 : index
    %34 = vector.load %arg11[%c0_25, %c0_26] : memref<1x16xf32, #tpu.memory_space<vmem>>, vector<1x16xf32>
    %35 = vector.broadcast %34 : vector<1x16xf32> to vector<256x16xf32>
    %36 = arith.addf %33, %35 : vector<256x16xf32>
    %37 = math.tanh %36 : vector<256x16xf32>
    %c0_27 = arith.constant 0 : index
    %c0_28 = arith.constant 0 : index
    %38 = vector.load %arg12[%c0_27, %c0_28] : memref<16x16xf32, #tpu.memory_space<vmem>>, vector<16x16xf32>
    %cst_29 = arith.constant dense<0.000000e+00> : vector<256x16xf32>
    %39 = tpu.matmul %37, %38, %cst_29 {dimension_numbers = #tpu.dot_dimension_numbers<[1], [0], [0], [1], [0, 0, 1, 1], [], []>} : vector<256x16xf32>, vector<16x16xf32>, vector<256x16xf32> -> vector<256x16xf32>
    %c0_30 = arith.constant 0 : index
    %c0_31 = arith.constant 0 : index
    %40 = vector.load %arg13[%c0_30, %c0_31] : memref<1x16xf32, #tpu.memory_space<vmem>>, vector<1x16xf32>
    %41 = vector.broadcast %40 : vector<1x16xf32> to vector<256x16xf32>
    %42 = arith.addf %39, %41 : vector<256x16xf32>
    %43 = arith.negf %42 : vector<256x16xf32>
    %44 = math.exp %43 : vector<256x16xf32>
    %cst_32 = arith.constant 1.000000e+00 : f32
    %45 = vector.broadcast %cst_32 : f32 to vector<256x16xf32>
    %46 = arith.addf %45, %44 : vector<256x16xf32>
    %47 = arith.divf %45, %46 : vector<256x16xf32>
    %48 = vector.shape_cast %47 : vector<256x16xf32> to vector<8x32x16xf32>
    %49 = tpu.transpose %48, [0, 2, 1] : vector<8x32x16xf32> -> vector<8x16x32xf32>
    %50 = vector.shape_cast %23 : vector<128x32xf32> to vector<8x16x32xf32>
    %51 = arith.addf %50, %49 : vector<8x16x32xf32>
    %52 = arith.mulf %0, %51 : vector<8x16x32xf32>
    %c0_33 = arith.constant 0 : index
    %c0_34 = arith.constant 0 : index
    %c0_35 = arith.constant 0 : index
    %53 = vector.load %arg14[%c0_33, %c0_34, %c0_35] : memref<8x16x32xf32, #tpu.memory_space<vmem>>, vector<8x16x32xf32>
    tpu.vector_store %arg14[%c0_33, %c0_34, %c0_35], %52 {strides = array<i32>} : memref<8x16x32xf32, #tpu.memory_space<vmem>>, vector<8x16x32xf32>,
    %c0_36 = arith.constant 0 : index
    %c0_37 = arith.constant 0 : index
    %c0_38 = arith.constant 0 : index
    %54 = vector.load %arg15[%c0_36, %c0_37, %c0_38] : memref<8x16x32xf32, #tpu.memory_space<vmem>>, vector<8x16x32xf32>
    tpu.vector_store %arg15[%c0_36, %c0_37, %c0_38], %49 {strides = array<i32>} : memref<8x16x32xf32, #tpu.memory_space<vmem>>, vector<8x16x32xf32>,
    return
  }
  func.func @transform_0(%arg0: i32) -> (i32, i32, i32) {
    %c0_i32 = arith.constant 0 : i32
    %c0_i32_0 = arith.constant 0 : i32
    %c0_i32_1 = arith.constant 0 : i32
    return %arg0, %c0_i32, %c0_i32_0 : i32, i32, i32
  }
  func.func @transform_1(%arg0: i32) -> (i32, i32) {
    %c0_i32 = arith.constant 0 : i32
    %c0_i32_0 = arith.constant 0 : i32
    %c0_i32_1 = arith.constant 0 : i32
    return %c0_i32, %c0_i32_0 : i32, i32
  }
  func.func @transform_2(%arg0: i32) -> (i32, i32) {
    %c0_i32 = arith.constant 0 : i32
    %c0_i32_0 = arith.constant 0 : i32
    %c0_i32_1 = arith.constant 0 : i32
    return %c0_i32, %c0_i32_0 : i32, i32
  }
  func.func @transform_3(%arg0: i32) -> (i32, i32) {
    %c0_i32 = arith.constant 0 : i32
    %c0_i32_0 = arith.constant 0 : i32
    %c0_i32_1 = arith.constant 0 : i32
    return %c0_i32, %c0_i32_0 : i32, i32
  }
  func.func @transform_4(%arg0: i32) -> (i32, i32) {
    %c0_i32 = arith.constant 0 : i32
    %c0_i32_0 = arith.constant 0 : i32
    %c0_i32_1 = arith.constant 0 : i32
    return %c0_i32, %c0_i32_0 : i32, i32
  }
  func.func @transform_5(%arg0: i32) -> (i32, i32) {
    %c0_i32 = arith.constant 0 : i32
    %c0_i32_0 = arith.constant 0 : i32
    %c0_i32_1 = arith.constant 0 : i32
    return %c0_i32, %c0_i32_0 : i32, i32
  }
  func.func @transform_6(%arg0: i32) -> (i32, i32) {
    %c0_i32 = arith.constant 0 : i32
    %c0_i32_0 = arith.constant 0 : i32
    %c0_i32_1 = arith.constant 0 : i32
    return %c0_i32, %c0_i32_0 : i32, i32
  }
  func.func @transform_7(%arg0: i32) -> (i32, i32) {
    %c0_i32 = arith.constant 0 : i32
    %c0_i32_0 = arith.constant 0 : i32
    %c0_i32_1 = arith.constant 0 : i32
    return %c0_i32, %c0_i32_0 : i32, i32
  }
  func.func @transform_8(%arg0: i32) -> (i32, i32) {
    %c0_i32 = arith.constant 0 : i32
    %c0_i32_0 = arith.constant 0 : i32
    %c0_i32_1 = arith.constant 0 : i32
    return %c0_i32, %c0_i32_0 : i32, i32
  }
  func.func @transform_9(%arg0: i32) -> (i32, i32) {
    %c0_i32 = arith.constant 0 : i32
    %c0_i32_0 = arith.constant 0 : i32
    %c0_i32_1 = arith.constant 0 : i32
    return %c0_i32, %c0_i32_0 : i32, i32
  }
  func.func @transform_10(%arg0: i32) -> (i32, i32) {
    %c0_i32 = arith.constant 0 : i32
    %c0_i32_0 = arith.constant 0 : i32
    %c0_i32_1 = arith.constant 0 : i32
    return %c0_i32, %c0_i32_0 : i32, i32
  }
  func.func @transform_11(%arg0: i32) -> (i32, i32) {
    %c0_i32 = arith.constant 0 : i32
    %c0_i32_0 = arith.constant 0 : i32
    %c0_i32_1 = arith.constant 0 : i32
    return %c0_i32, %c0_i32_0 : i32, i32
  }
  func.func @transform_12(%arg0: i32) -> (i32, i32) {
    %c0_i32 = arith.constant 0 : i32
    %c0_i32_0 = arith.constant 0 : i32
    %c0_i32_1 = arith.constant 0 : i32
    return %c0_i32, %c0_i32_0 : i32, i32
  }
  func.func @transform_13(%arg0: i32) -> (i32, i32, i32) {
    %c0_i32 = arith.constant 0 : i32
    %c0_i32_0 = arith.constant 0 : i32
    %c0_i32_1 = arith.constant 0 : i32
    return %arg0, %c0_i32, %c0_i32_0 : i32, i32, i32
  }
  func.func @transform_14(%arg0: i32) -> (i32, i32, i32) {
    %c0_i32 = arith.constant 0 : i32
    %c0_i32_0 = arith.constant 0 : i32
    %c0_i32_1 = arith.constant 0 : i32
    return %arg0, %c0_i32, %c0_i32_0 : i32, i32, i32
  }
}

</mosaic_0001>

<bundles_post_ra>
// kernel: tpu_custom_call.1
= control target key start
LH: loop header
LB: loop body
LE: loop exit
PB: predicated region body
PF: predicated region fallthrough
CT: control target
= control target key end

     0   :  { %20 = vsyncpa [#allocation3], 0  ;;  %s4503_s0 = inlined_call_operand.hbm [shape: f32[8,16,32], index: 0, kind: input, shape index: {}]   ;;  %s4504_s1 = inlined_call_operand.vmem [shape: f32[32,16], index: 1, kind: input, shape index: {}]   ;;  %s4505_s2 = inlined_call_operand.vmem [shape: f32[1,16], index: 2, kind: input, shape index: {}]   ;;  %s4506_s3 = inlined_call_operand.vmem [shape: f32[16,32], index: 3, kind: input, shape index: {}]   ;;  %s4507_s4 = inlined_call_operand.vmem [shape: f32[1,32], index: 4, kind: input, shape index: {}]   ;;  %s4508_s5 = inlined_call_operand.vmem [shape: f32[32,32], index: 5, kind: input, shape index: {}]   ;;  %s4509_s6 = inlined_call_operand.hbm [shape: f32[1,32], index: 6, kind: input, shape index: {}]   ;;  %s4510_s7 = inlined_call_operand.vmem [shape: f32[16,8], index: 7, kind: input, shape index: {}]   ;;  %s4511_s8 = inlined_call_operand.vmem [shape: f32[1,8], index: 8, kind: input, shape index: {}]   ;;  %s4512_s9 = inlined_call_operand.vmem [shape: f32[8,16], index: 9, kind: input, shape index: {}]   ;;  %s4513_s10 = inlined_call_operand.vmem [shape: f32[1,16], index: 10, kind: input, shape index: {}]   ;;  %s4514_s11 = inlined_call_operand.vmem [shape: f32[16,16], index: 11, kind: input, shape index: {}]   ;;  %s4515_s12 = inlined_call_operand.vmem [shape: f32[1,16], index: 12, kind: input, shape index: {}]   ;;  %s4516_s13 = inlined_call_operand.hbm [shape: f32[8,16,32], index: 13, kind: output, shape index: {0}]   ;;  %s4517_s14 = inlined_call_operand.hbm [shape: f32[8,16,32], index: 14, kind: output, shape index: {1}]  }
   0x1   :  { %21 = vsyncpa [#allocation6], 0 }
   0x2   :  { %22 = vsyncpa [#allocation4], 0 }
   0x3   :  { %23 = vsyncpa [#allocation9], 0  ;;  %s3825_s29 = smov [#allocation2]   ;;  %s3729_s17 = scalar_lea.hbm %s4503_s0, 2048 }
   0x4   :  { %s29_s30 = sshll.u32 %s3825_s29, 4  ;;  %p3730_p0 = scmp.ne.s32.totalorder %s4503_s0, %s3729_s17  ;;  %s30_s30 = int_to_ptr.vmem [resolvable:$true] %s29_s30 }
   0x5   :  { %p3733_p1 = scmp.lt.u32.totalorder %s3729_s17, %s4503_s0 }
   0x7   :  { %p3735_p2 = pnand %p3733_p1, %p3730_p0 }
   0x9   :  { %3738 = shalt.err (!%p3735_p2)
}
   0xa   :  { %s3739_s22 = scalar_lea.vmem %s30_s30, 2048  ;;  %p3744_p4 = scmp.lt.s32.totalorder %s30_s30, %s30_s30 }
   0xb   :  { %p3740_p3 = scmp.ne.s32.totalorder %s30_s30, %s3739_s22  ;;  %p3745_p5 = scmp.lt.s32.totalorder %s3739_s22, %s3739_s22 }
   0xd   :  { %p3746_p6 = por %p3745_p5, %p3744_p4 }
   0xf   :  { %p3747_p7 = pnand %p3746_p6, %p3740_p3 }
  0x11   :  { %3750 = shalt.err (!%p3747_p7)
}
  0x12   :  { %s3826_s23 = smov 128   ;;  %s3827_s24 = smov 8  }
  0x13   :  { %35 = dma.hbm_to_vmem [thread:$0]  %s4503_s0, 2048, %s30_s30, [#allocation3], %s3826_s23, %s3826_s23, %s3827_s24  }
  0x14   :  { %s3828_s27 = smov [#allocation5]   ;;  %s3751_s16 = scalar_lea.hbm %s4509_s6, 16 }
  0x15   :  { %s52_s28 = sshll.u32 %s3828_s27, 4  ;;  %p3752_p8 = scmp.ne.s32.totalorder %s4509_s6, %s3751_s16  ;;  %s53_s28 = int_to_ptr.vmem [resolvable:$true] %s52_s28 }
  0x16   :  { %p3755_p9 = scmp.lt.u32.totalorder %s3751_s16, %s4509_s6 }
  0x18   :  { %p3757_p10 = pnand %p3755_p9, %p3752_p8 }
  0x1a   :  { %3760 = shalt.err (!%p3757_p10)
}
  0x1b   :  { %s3761_s21 = scalar_lea.vmem %s53_s28, 16  ;;  %s3765_s0 = scalar_lea.vmem %s53_s28, 32 }
  0x1c   :  { %p3762_p11 = scmp.ne.s32.totalorder %s53_s28, %s3761_s21  ;;  %p3766_p12 = scmp.lt.s32.totalorder %s53_s28, %s53_s28 }
  0x1d   :  { %p3767_p13 = scmp.lt.s32.totalorder %s3765_s0, %s3761_s21 }
  0x1f   :  { %p3768_p0 = por %p3767_p13, %p3766_p12 }
  0x21   :  { %p3769_p1 = pnand %p3768_p0, %p3762_p11 }
  0x23   :  { %3772 = shalt.err (!%p3769_p1)
}
  0x24   :  { %55 = dma.hbm_to_vmem [thread:$0]  %s4509_s6, 16, %s53_s28, [#allocation6]  }
  0x25   :  { %3817 = dma.done.wait [#allocation3], 2048  }
  0x26   :  { %3818 = vsyncadd [#allocation3], 4294965248 }
  0x27   :  { %3819 = dma.done.wait [#allocation6], 16  }
  0x28   :  { %3820 = vsyncadd [#allocation6], 4294967280  ;;  %vm101_vm0 = vcmask 261120   ;;  %v90_v0 = vld [vmem:[%s4504_s1] sm:$0xff]  ;;  %v91_v1 = vld [vmem:[%s4504_s1 + $0x8] sm:$0xff]  ;;  %vm320_vm1 = vcmask 130048  }
  0x29   :  { %v92_v2 = vld [vmem:[%s4504_s1 + $0x10] sm:$0xff]  ;;  %v3289_v3 = vpack.c.bf16 %v91_v1, %v90_v0  ;;  %v93_v4 = vld [vmem:[%s4504_s1 + $0x18] sm:$0xff]  ;;  %v74_v5 = vld [vmem:[#allocation2] sm:$0xff]  ;;  %vm1456_vm2 = vcmask 64512   ;;  %s3830_s0 = smov [#allocation7]  }
  0x2a   :  { %v3293_v6 = vpack.c.bf16 %v93_v4, %v92_v2  ;;  %3051 = vmatprep.mubr.msk.f32.mxu0 %vm101_vm0, %v74_v5  ;;  %830 = vxpose.xlu0.b32.start [1/2] (short) (narrow) %v74_v5, 32  ;;  %v82_v7 = vld [vmem:[#allocation2 + $0x40] sm:$0xff]  ;;  %v75_v8 = vld [vmem:[#allocation2 + $0x8] sm:$0xff]  ;;  %v76_v9 = vld [vmem:[#allocation2 + $0x10] sm:$0xff]  ;;  %s2657_s30 = sshll.u32 %s3830_s0, 4  ;;  %s2658_s30 = int_to_ptr.vmem [resolvable:$true] %s2657_s30 }
  0x2b   :  { %3290 = vmatprep.subr.bf16.mxu0 %v3289_v3  ;;  %3317 = vmatprep.subr.bf16.mxu1 %v3289_v3  ;;  %v311_v10 = vld [vmem:[%s4506_s3] sm:$0xff]  ;;  %v312_v11 = vld [vmem:[%s4506_s3 + $0x8] sm:$0xff]  ;;  %v84_v14 = vld [vmem:[#allocation2 + $0x50] sm:$0xff] }
  0x2c   :  { %3292 = vmatpush3.bf16.msra.mxu0 %v3289_v3  ;;  %3319 = vmatpush3.bf16.msra.mxu1 %v3289_v3  ;;  %v83_v12 = vld [vmem:[#allocation2 + $0x48] sm:$0xff]  ;;  %v3297_v13 = vpack.c.bf16 %v312_v11, %v311_v10  ;;  %v77_v15 = vld [vmem:[#allocation2 + $0x18] sm:$0xff]  ;;  %v78_v17 = vld [vmem:[#allocation2 + $0x20] sm:$0xff] }
  0x2d   :  { %3294 = vmatprep.subr.bf16.mxu0 %v3293_v6  ;;  %3318 = vmatprep.subr.bf16.mxu1 %v3293_v6  ;;  %v85_v16 = vld [vmem:[#allocation2 + $0x58] sm:$0xff]  ;;  %v86_v18 = vld [vmem:[#allocation2 + $0x60] sm:$0xff]  ;;  %v79_v19 = vld [vmem:[#allocation2 + $0x28] sm:$0xff] }
  0x2e   :  { %3063 = vmatprep.mubr.msk.f32.mxu1 %vm101_vm0, %v82_v7  ;;  %831 = vxpose.xlu0.b32.end [2/2] (short) (narrow) %v75_v8, 32  ;;  %v87_v20 = vld [vmem:[#allocation2 + $0x68] sm:$0xff]  ;;  %v80_v21 = vld [vmem:[#allocation2 + $0x30] sm:$0xff]  ;;  %v81_v23 = vld [vmem:[#allocation2 + $0x38] sm:$0xff] }
  0x2f   :  { %862 = vxpose.xlu1.b32.start [1/2] (short) (narrow) %v76_v9, 32  ;;  %v88_v22 = vld [vmem:[#allocation2 + $0x70] sm:$0xff]  ;;  %v89_v24 = vld [vmem:[#allocation2 + $0x78] sm:$0xff]  ;;  %v1086_v25 = vld [vmem:[%s4510_s7] sm:$0xff] }
  0x30   :  { %3296 = vmatpush3.bf16.msra.mxu0 %v3293_v6  ;;  %3320 = vmatpush3.bf16.msra.mxu1 %v3293_v6  ;;  %v1087_v26 = vld [vmem:[%s4510_s7 + $0x8] sm:$0xff]  ;;  %v530_v32 = vld [vmem:[%s4508_s5] sm:$0xff] }
  0x31   :  { %3298 = vmatprep.subr.bf16.mxu1 %v3297_v13  ;;  %v3309_v27 = vpack.c.bf16 %v1087_v26, %v1086_v25  ;;  %v531_v33 = vld [vmem:[%s4508_s5 + $0x8] sm:$0xff]  ;;  %v4017_v63 = vld [vmem:[%s4505_s2] ss:$0 sm:$0xff] }
  0x32   :  { %v3982_v34 = vpack.c.bf16 %v531_v33, %v530_v32 }
  0x33   :  { %3052 = vmatmul.mubr.msk.f32.vlgmr.msra.gmra.mrb[0].mxu0 %vm101_vm0, %v75_v8  ;;  %3064 = vmatmul.mubr.msk.f32.vlgmr.msra.gmra.mrb[0].mxu1 %vm101_vm0, %v83_v12 }
  0x34   :  { %3054 = vmatprep.mubr.msk.f32.mxu0 %vm101_vm0, %v76_v9  ;;  %3066 = vmatprep.mubr.msk.f32.mxu1 %vm101_vm0, %v84_v14 }
  0x35   :  { %863 = vxpose.xlu1.b32.end [2/2] (short) (narrow) %v77_v15, 32  ;;  %3300 = vmatpush3.bf16.msra.mxu1 %v3297_v13 }
  0x36   :  { %3310 = vmatprep.subr.bf16.mxu0 %v3309_v27  ;;  %3302 = vmatprep.subr.bf16.mxu1 %v3982_v34 }
  0x37   :  { %3055 = vmatmul.mubr.msk.f32.gmra.mrb[2].mxu0 %vm101_vm0, %v77_v15  ;;  %3067 = vmatmul.mubr.msk.f32.gmra.mrb[2].mxu1 %vm101_vm0, %v85_v16 }
  0x38   :  { %3057 = vmatprep.mubr.msk.f32.mxu0 %vm101_vm0, %v78_v17  ;;  %3069 = vmatprep.mubr.msk.f32.mxu1 %vm101_vm0, %v86_v18 }
  0x39   :  { %894 = vxpose.xlu0.b32.start [1/2] (short) (narrow) %v78_v17, 32  ;;  %3312 = vmatpush3.bf16.msra.mxu0 %v3309_v27 }
  0x3b   :  { %3058 = vmatmul.mubr.msk.f32.gmra.mrb[4].mxu0 %vm101_vm0, %v79_v19  ;;  %3070 = vmatmul.mubr.msk.f32.gmra.mrb[4].mxu1 %vm101_vm0, %v87_v20 }
  0x3c   :  { %3060 = vmatprep.mubr.msk.f32.mxu0 %vm101_vm0, %v80_v21  ;;  %3072 = vmatprep.mubr.msk.f32.mxu1 %vm101_vm0, %v88_v22 }
  0x3d   :  { %895 = vxpose.xlu0.b32.end [2/2] (short) (narrow) %v79_v19, 32  ;;  %v532_v19 = vld [vmem:[%s4508_s5 + $0x10] sm:$0xff] }
  0x3e   :  { %926 = vxpose.xlu1.b32.start [1/2] (short) (narrow) %v80_v21, 32 }
  0x3f   :  { %3061 = vmatmul.mubr.msk.f32.gmra.mrb[6].mxu0 %vm101_vm0, %v81_v23  ;;  %3073 = vmatmul.mubr.msk.f32.gmra.mrb[6].mxu1 %vm101_vm0, %v89_v24 }
  0x42   :  { %927 = vxpose.xlu1.b32.end [2/2] (short) (narrow) %v81_v23, 32 }
  0x46   :  { %958 = vxpose.xlu0.b32.start [1/2] (short) (narrow) %v82_v7, 32 }
  0x4a   :  { %959 = vxpose.xlu0.b32.end [2/2] (short) (narrow) %v83_v12, 32 }
  0x4b   :  { %990 = vxpose.xlu1.b32.start [1/2] (short) (narrow) %v84_v14, 32 }
  0x4f   :  { %991 = vxpose.xlu1.b32.end [2/2] (short) (narrow) %v85_v16, 32 }
  0x53   :  { %1022 = vxpose.xlu0.b32.start [1/2] (short) (narrow) %v86_v18, 32 }
  0x57   :  { %1023 = vxpose.xlu0.b32.end [2/2] (short) (narrow) %v87_v20, 32  ;;  %v533_v20 = vld [vmem:[%s4508_s5 + $0x18] sm:$0xff] }
  0x58   :  { %1054 = vxpose.xlu1.b32.start [1/2] (short) (narrow) %v88_v22, 32 }
  0x5c   :  { %1055 = vxpose.xlu1.b32.end [2/2] (short) (narrow) %v89_v24, 32 }
  0xaa   :  { %v846_v28 = vpop.trf.xlu0 }
  0xab   :  { %3139 = vmatprep.mubr.msk.f32.mxu0 %vm320_vm1, %v846_v28  ;;  %v3305_v28 = vpack.c.bf16 %v533_v20, %v532_v19  ;;  %v1810_v20 = vld [vmem:[%s4514_s11] sm:$0xff] }
  0xae   :  { %v847_v29 = vpop.trf.xlu0 }
  0xaf   :  { %3140 = vmatmul.mubr.msk.f32.vlgmr.msra.gmra.mrb[8].mxu0 %vm320_vm1, %v847_v29 }
  0xb1   :  { %v878_v30 = vpop.trf.xlu1 }
  0xb2   :  { %v848_v31 = vpop.trf.xlu0 }
  0xb3   :  { %3142 = vmatprep.mubr.msk.f32.mxu0 %vm320_vm1, %v848_v31 }
  0xb5   :  { %v879_v35 = vpop.trf.xlu1 }
  0xb6   :  { %v849_v36 = vpop.trf.xlu0 }
  0xb7   :  { %3143 = vmatmul.mubr.msk.f32.gmra.mrb[10].mxu0 %vm320_vm1, %v849_v36 }
  0xb8   :  { %3145 = vmatprep.mubr.msk.f32.mxu0 %vm320_vm1, %v878_v30 }
  0xb9   :  { %v880_v37 = vpop.trf.xlu1 }
  0xba   :  { %v910_v38 = vpop.trf.xlu0 }
  0xbb   :  { %3146 = vmatmul.mubr.msk.f32.gmra.mrb[12].mxu0 %vm320_vm1, %v879_v35 }
  0xbc   :  { %3148 = vmatprep.mubr.msk.f32.mxu0 %vm320_vm1, %v880_v37 }
  0xbd   :  { %v881_v39 = vpop.trf.xlu1 }
  0xbe   :  { %v911_v40 = vpop.trf.xlu0 }
  0xbf   :  { %3149 = vmatmul.mubr.msk.f32.gmra.mrb[14].mxu0 %vm320_vm1, %v881_v39 }
  0xc0   :  { %3151 = vmatprep.mubr.msk.f32.mxu0 %vm320_vm1, %v910_v38 }
  0xc1   :  { %v942_v41 = vpop.trf.xlu1 }
  0xc2   :  { %v912_v42 = vpop.trf.xlu0 }
  0xc3   :  { %3152 = vmatmul.mubr.msk.f32.gmra.mrb[16].mxu0 %vm320_vm1, %v911_v40 }
  0xc4   :  { %3154 = vmatprep.mubr.msk.f32.mxu0 %vm320_vm1, %v912_v42 }
  0xc5   :  { %v943_v43 = vpop.trf.xlu1 }
  0xc6   :  { %v913_v44 = vpop.trf.xlu0 }
  0xc7   :  { %3155 = vmatmul.mubr.msk.f32.gmra.mrb[18].mxu0 %vm320_vm1, %v913_v44 }
  0xc8   :  { %3157 = vmatprep.mubr.msk.f32.mxu0 %vm320_vm1, %v942_v41 }
  0xc9   :  { %v944_v45 = vpop.trf.xlu1 }
  0xca   :  { %v974_v46 = vpop.trf.xlu0 }
  0xcb   :  { %3158 = vmatmul.mubr.msk.f32.gmra.mrb[20].mxu0 %vm320_vm1, %v943_v43 }
  0xcc   :  { %3160 = vmatprep.mubr.msk.f32.mxu0 %vm320_vm1, %v944_v45 }
  0xcd   :  { %v945_v47 = vpop.trf.xlu1 }
  0xce   :  { %v975_v48 = vpop.trf.xlu0 }
  0xcf   :  { %3161 = vmatmul.mubr.msk.f32.gmra.mrb[22].mxu0 %vm320_vm1, %v945_v47 }
  0xd0   :  { %3163 = vmatprep.mubr.msk.f32.mxu0 %vm320_vm1, %v974_v46 }
  0xd1   :  { %v1006_v49 = vpop.trf.xlu1 }
  0xd2   :  { %v976_v50 = vpop.trf.xlu0 }
  0xd3   :  { %3164 = vmatmul.mubr.msk.f32.gmra.mrb[24].mxu0 %vm320_vm1, %v975_v48 }
  0xd4   :  { %3166 = vmatprep.mubr.msk.f32.mxu0 %vm320_vm1, %v976_v50 }
  0xd5   :  { %v1007_v51 = vpop.trf.xlu1 }
  0xd6   :  { %v977_v52 = vpop.trf.xlu0 }
  0xd7   :  { %3167 = vmatmul.mubr.msk.f32.gmra.mrb[26].mxu0 %vm320_vm1, %v977_v52 }
  0xd8   :  { %3169 = vmatprep.mubr.msk.f32.mxu0 %vm320_vm1, %v1006_v49 }
  0xd9   :  { %v1008_v53 = vpop.trf.xlu1 }
  0xda   :  { %v1038_v54 = vpop.trf.xlu0 }
  0xdb   :  { %3170 = vmatmul.mubr.msk.f32.gmra.mrb[28].mxu0 %vm320_vm1, %v1007_v51  ;;  %v4061_v51 = vld [vmem:[%s4512_s9] sm:$0xff] }
  0xdc   :  { %3172 = vmatprep.mubr.msk.f32.mxu0 %vm320_vm1, %v1008_v53 }
  0xdd   :  { %v1009_v55 = vpop.trf.xlu1 }
  0xde   :  { %v1039_v56 = vpop.trf.xlu0 }
  0xdf   :  { %3173 = vmatmul.mubr.msk.f32.gmra.mrb[30].mxu0 %vm320_vm1, %v1009_v55 }
  0xe0   :  { %3175 = vmatprep.mubr.msk.f32.mxu0 %vm320_vm1, %v1038_v54 }
  0xe1   :  { %v1070_v57 = vpop.trf.xlu1 }
  0xe2   :  { %v1040_v58 = vpop.trf.xlu0 }
  0xe3   :  { %3176 = vmatmul.mubr.msk.f32.gmra.mrb[32].mxu0 %vm320_vm1, %v1039_v56 }
  0xe4   :  { %3178 = vmatprep.mubr.msk.f32.mxu0 %vm320_vm1, %v1040_v58 }
  0xe5   :  { %v1071_v59 = vpop.trf.xlu1 }
  0xe6   :  { %v1041_v60 = vpop.trf.xlu0 }
  0xe7   :  { %3179 = vmatmul.mubr.msk.f32.gmra.mrb[34].mxu0 %vm320_vm1, %v1041_v60 }
  0xe8   :  { %3181 = vmatprep.mubr.msk.f32.mxu0 %vm320_vm1, %v1070_v57 }
  0xe9   :  { %v1072_v61 = vpop.trf.xlu1 }
  0xeb   :  { %3182 = vmatmul.mubr.msk.f32.gmra.mrb[36].mxu0 %vm320_vm1, %v1071_v59 }
  0xec   :  { %3184 = vmatprep.mubr.msk.f32.mxu0 %vm320_vm1, %v1072_v61 }
  0xed   :  { %v1073_v62 = vpop.trf.xlu1 }
  0xef   :  { %3185 = vmatmul.mubr.msk.f32.gmra.mrb[38].mxu0 %vm320_vm1, %v1073_v62 }
 0x106   :  { %v3053_v0 = vpop.f32.mrb[0].mxu0  ;;  %v3065_v1 = vpop.f32.mrb[0].mxu1 }
 0x107   :  { %v222_v2 = vadd.f32 %v3053_v0, %v4017_v63  ;;  %v216_v3 = vpop.f32.mrb[1].mxu0  ;;  %v256_v4 = vpop.f32.mrb[1].mxu1  ;;  %v262_v31 = vadd.f32 %v3065_v1, %v4017_v63 }
 0x108   :  { %v217_v5 = vadd.f32 %v4017_v63, %v216_v3  ;;  %v257_v18 = vadd.f32 %v4017_v63, %v256_v4 }
 0x10a   :  { %3328 = vtanh.f32 %v217_v5  ;;  %v3056_v6 = vpop.f32.mrb[2].mxu0  ;;  %v3068_v7 = vpop.f32.mrb[2].mxu1 }
 0x10b   :  { %3330 = vtanh.f32 %v222_v2  ;;  %v232_v8 = vadd.f32 %v3056_v6, %v4017_v63  ;;  %v226_v9 = vpop.f32.mrb[3].mxu0  ;;  %v266_v10 = vpop.f32.mrb[3].mxu1  ;;  %v272_v36 = vadd.f32 %v3068_v7, %v4017_v63 }
 0x10c   :  { %v227_v11 = vadd.f32 %v4017_v63, %v226_v9  ;;  %v267_v30 = vadd.f32 %v4017_v63, %v266_v10 }
 0x10e   :  { %3332 = vtanh.f32 %v227_v11  ;;  %v3059_v12 = vpop.f32.mrb[4].mxu0  ;;  %v3071_v13 = vpop.f32.mrb[4].mxu1 }
 0x10f   :  { %3334 = vtanh.f32 %v232_v8  ;;  %v242_v14 = vadd.f32 %v3059_v12, %v4017_v63  ;;  %v236_v15 = vpop.f32.mrb[5].mxu0  ;;  %v276_v16 = vpop.f32.mrb[5].mxu1  ;;  %v282_v40 = vadd.f32 %v3071_v13, %v4017_v63 }
 0x110   :  { %v237_v17 = vadd.f32 %v4017_v63, %v236_v15  ;;  %v277_v35 = vadd.f32 %v4017_v63, %v276_v16 }
 0x112   :  { %3336 = vtanh.f32 %v237_v17  ;;  %v3062_v21 = vpop.f32.mrb[6].mxu0  ;;  %v3074_v22 = vpop.f32.mrb[6].mxu1 }
 0x113   :  { %3338 = vtanh.f32 %v242_v14  ;;  %v252_v23 = vadd.f32 %v3062_v21, %v4017_v63  ;;  %v246_v24 = vpop.f32.mrb[7].mxu0  ;;  %v286_v25 = vpop.f32.mrb[7].mxu1  ;;  %v292_v43 = vadd.f32 %v3074_v22, %v4017_v63  ;;  %v1811_v21 = vld [vmem:[%s4514_s11 + $0x8] sm:$0xff] }
 0x114   :  { %v3329_v26 = vpop.eup %3328  ;;  %v247_v27 = vadd.f32 %v4017_v63, %v246_v24  ;;  %3340 = vtanh.f32 %v257_v18  ;;  %v3313_v22 = vpack.c.bf16 %v1811_v21, %v1810_v20 }
 0x115   :  { %v3331_v29 = vpop.eup %3330  ;;  %3079 = vmatprep.mubr.msk.f32.mxu1 %vm320_vm1, %v3329_v26 }
 0x116   :  { %3342 = vtanh.f32 %v247_v27  ;;  %3080 = vmatmul.mubr.msk.f32.vlgmr.msra.gmra.mrb[8].mxu1 %vm320_vm1, %v3331_v29  ;;  %3314 = vmatprep.subr.bf16.mxu0 %v3313_v22 }
 0x117   :  { %3344 = vtanh.f32 %v252_v23  ;;  %3304 = vmatpush3.bf16.msra.mxu1 %v3982_v34  ;;  %v287_v34 = vadd.f32 %v4017_v63, %v286_v25  ;;  %3316 = vmatpush3.bf16.msra.mxu0 %v3313_v22  ;;  %v4137_v23 = vld [vmem:[%s4507_s4] ss:$0 sm:$0xff] }
 0x118   :  { %v3333_v32 = vpop.eup %3332  ;;  %3306 = vmatprep.subr.bf16.mxu1 %v3305_v28  ;;  %3346 = vtanh.f32 %v267_v30 }
 0x119   :  { %v3335_v33 = vpop.eup %3334  ;;  %3082 = vmatprep.mubr.msk.f32.mxu1 %vm320_vm1, %v3333_v32  ;;  %3348 = vtanh.f32 %v262_v31 }
 0x11a   :  { %3083 = vmatmul.mubr.msk.f32.gmra.mrb[10].mxu1 %vm320_vm1, %v3335_v33  ;;  %3350 = vtanh.f32 %v277_v35 }
 0x11b   :  { %3308 = vmatpush3.bf16.msra.mxu1 %v3305_v28  ;;  %3352 = vtanh.f32 %v272_v36 }
 0x11c   :  { %v3337_v37 = vpop.eup %3336  ;;  %3354 = vtanh.f32 %v287_v34  ;;  %3187 = vmatprep.subr.mxu1 %v4061_v51 }
 0x11d   :  { %v3339_v38 = vpop.eup %3338  ;;  %3085 = vmatprep.mubr.msk.f32.mxu1 %vm320_vm1, %v3337_v37  ;;  %3356 = vtanh.f32 %v282_v40 }
 0x11e   :  { %3086 = vmatmul.mubr.msk.f32.gmra.mrb[12].mxu1 %vm320_vm1, %v3339_v38  ;;  %v3341_v39 = vpop.eup %3340  ;;  %3358 = vtanh.f32 %v292_v43 }
 0x120   :  { %v3343_v41 = vpop.eup %3342 }
 0x121   :  { %v3345_v42 = vpop.eup %3344  ;;  %3088 = vmatprep.mubr.msk.f32.mxu1 %vm320_vm1, %v3343_v41 }
 0x122   :  { %3089 = vmatmul.mubr.msk.f32.gmra.mrb[14].mxu1 %vm320_vm1, %v3345_v42  ;;  %v3347_v44 = vpop.eup %3346 }
 0x123   :  { %3091 = vmatprep.mubr.msk.f32.mxu1 %vm320_vm1, %v3341_v39  ;;  %v3349_v45 = vpop.eup %3348 }
 0x124   :  { %v3351_v46 = vpop.eup %3350 }
 0x125   :  { %v3353_v47 = vpop.eup %3352 }
 0x126   :  { %3092 = vmatmul.mubr.msk.f32.gmra.mrb[16].mxu1 %vm320_vm1, %v3349_v45  ;;  %v3355_v48 = vpop.eup %3354 }
 0x127   :  { %3094 = vmatprep.mubr.msk.f32.mxu1 %vm320_vm1, %v3347_v44  ;;  %v3357_v49 = vpop.eup %3356 }
 0x128   :  { %v3359_v50 = vpop.eup %3358 }
 0x12a   :  { %3095 = vmatmul.mubr.msk.f32.gmra.mrb[18].mxu1 %vm320_vm1, %v3353_v47 }
 0x12b   :  { %3097 = vmatprep.mubr.msk.f32.mxu1 %vm320_vm1, %v3351_v46 }
 0x12e   :  { %3098 = vmatmul.mubr.msk.f32.gmra.mrb[20].mxu1 %vm320_vm1, %v3357_v49 }
 0x12f   :  { %3100 = vmatprep.mubr.msk.f32.mxu1 %vm320_vm1, %v3355_v48 }
 0x132   :  { %3101 = vmatmul.mubr.msk.f32.gmra.mrb[22].mxu1 %vm320_vm1, %v3359_v50 }
 0x182   :  { %v4064_v52 = vpop.f32.mrb[8].mxu0 }
 0x183   :  { %v4066_v53 = vpop.f32.mrb[9].mxu0 }
 0x18a   :  { %v4068_v54 = vpop.f32.mrb[10].mxu0 }
 0x18b   :  { %v4070_v55 = vpop.f32.mrb[11].mxu0 }
 0x18e   :  { %v4072_v56 = vpop.f32.mrb[12].mxu0 }
 0x18f   :  { %v4074_v57 = vpop.f32.mrb[13].mxu0 }
 0x192   :  { %v4076_v58 = vpop.f32.mrb[14].mxu0 }
 0x193   :  { %v4078_v59 = vpop.f32.mrb[15].mxu0 }
 0x196   :  { %v4080_v60 = vpop.f32.mrb[16].mxu0 }
 0x197   :  { %v4082_v61 = vpop.f32.mrb[17].mxu0 }
 0x19a   :  { %v4084_v62 = vpop.f32.mrb[18].mxu0 }
 0x19b   :  { %v4086_v63 = vpop.f32.mrb[19].mxu0 }
 0x19e   :  { %v4088_v0 = vpop.f32.mrb[20].mxu0 }
 0x19f   :  { %v4090_v1 = vpop.f32.mrb[21].mxu0 }
 0x1a2   :  { %v4092_v2 = vpop.f32.mrb[22].mxu0 }
 0x1a3   :  { %v4094_v3 = vpop.f32.mrb[23].mxu0 }
 0x1a6   :  { %v4096_v4 = vpop.f32.mrb[24].mxu0 }
 0x1a7   :  { %v4098_v5 = vpop.f32.mrb[25].mxu0 }
 0x1aa   :  { %v4100_v6 = vpop.f32.mrb[26].mxu0 }
 0x1ab   :  { %v4102_v7 = vpop.f32.mrb[27].mxu0 }
 0x1ae   :  { %v4104_v8 = vpop.f32.mrb[28].mxu0 }
 0x1af   :  { %v4106_v9 = vpop.f32.mrb[29].mxu0 }
 0x1b2   :  { %v4108_v10 = vpop.f32.mrb[30].mxu0 }
 0x1b3   :  { %v4110_v11 = vpop.f32.mrb[31].mxu0 }
 0x1b6   :  { %v4112_v12 = vpop.f32.mrb[32].mxu0 }
 0x1b7   :  { %v4114_v13 = vpop.f32.mrb[33].mxu0 }
 0x1ba   :  { %v4116_v14 = vpop.f32.mrb[34].mxu0 }
 0x1bb   :  { %v4118_v15 = vpop.f32.mrb[35].mxu0 }
 0x1be   :  { %v4120_v16 = vpop.f32.mrb[36].mxu0 }
 0x1bf   :  { %v4122_v17 = vpop.f32.mrb[37].mxu0 }
 0x1c2   :  { %v4124_v18 = vpop.f32.mrb[38].mxu0 }
 0x1c3   :  { %v4126_v19 = vpop.f32.mrb[39].mxu0 }
 0x1e9   :  { %v3081_v24 = vpop.f32.mrb[8].mxu1 }
 0x1ea   :  { %v441_v25 = vadd.f32 %v3081_v24, %v4137_v23  ;;  %v435_v26 = vpop.f32.mrb[9].mxu1 }
 0x1eb   :  { %v436_v27 = vadd.f32 %v4137_v23, %v435_v26 }
 0x1ed   :  { %3360 = vtanh.f32 %v436_v27  ;;  %v3084_v28 = vpop.f32.mrb[10].mxu1 }
 0x1ee   :  { %3362 = vtanh.f32 %v441_v25  ;;  %v451_v29 = vadd.f32 %v3084_v28, %v4137_v23  ;;  %v445_v30 = vpop.f32.mrb[11].mxu1 }
 0x1ef   :  { %v446_v31 = vadd.f32 %v4137_v23, %v445_v30 }
 0x1f1   :  { %3364 = vtanh.f32 %v446_v31  ;;  %v3087_v32 = vpop.f32.mrb[12].mxu1 }
 0x1f2   :  { %3366 = vtanh.f32 %v451_v29  ;;  %v461_v33 = vadd.f32 %v3087_v32, %v4137_v23  ;;  %v455_v35 = vpop.f32.mrb[13].mxu1  ;;  %v4164_v29 = vld [vmem:[%s4511_s8] ss:$0 sm:$0xff] }
 0x1f3   :  { %v456_v36 = vadd.f32 %v4137_v23, %v455_v35  ;;  %v1258_v35 = vadd.f32 %v4164_v29, %v4066_v53  ;;  %v1273_v53 = vadd.f32 %v4068_v54, %v4164_v29 }
 0x1f5   :  { %3368 = vtanh.f32 %v456_v36  ;;  %v3090_v37 = vpop.f32.mrb[14].mxu1 }
 0x1f6   :  { %3370 = vtanh.f32 %v461_v33  ;;  %v471_v38 = vadd.f32 %v3090_v37, %v4137_v23  ;;  %v465_v34 = vpop.f32.mrb[15].mxu1 }
 0x1f7   :  { %v3361_v39 = vpop.eup %3360  ;;  %v466_v40 = vadd.f32 %v4137_v23, %v465_v34  ;;  %v1263_v34 = vadd.f32 %v4064_v52, %v4164_v29  ;;  %v1288_v52 = vadd.f32 %v4164_v29, %v4078_v59 }
 0x1f8   :  { %v3363_v41 = vpop.eup %3362  ;;  %3111 = vmatprep.mubr.msk.f32.mxu1 %vm101_vm0, %v3361_v39 }
 0x1f9   :  { %3372 = vtanh.f32 %v466_v40  ;;  %v3093_v42 = vpop.f32.mrb[16].mxu1  ;;  %3112 = vmatmul.mubr.msk.f32.vlgmr.msra.gmra.mrb[24].mxu1 %vm101_vm0, %v3363_v41 }
 0x1fa   :  { %3374 = vtanh.f32 %v471_v38  ;;  %v481_v43 = vadd.f32 %v3093_v42, %v4137_v23  ;;  %3188 = vmatpush3.msra.mxu1 %v4061_v51  ;;  %v475_v44 = vpop.f32.mrb[17].mxu1  ;;  %v1268_v38 = vadd.f32 %v4164_v29, %v4070_v55  ;;  %v1278_v55 = vadd.f32 %v4164_v29, %v4074_v57 }
 0x1fb   :  { %v3365_v45 = vpop.eup %3364  ;;  %v476_v46 = vadd.f32 %v4137_v23, %v475_v44  ;;  %v1283_v42 = vadd.f32 %v4072_v56, %v4164_v29  ;;  %v1293_v57 = vadd.f32 %v4076_v58, %v4164_v29  ;;  %v1298_v56 = vadd.f32 %v4164_v29, %v4082_v61 }
 0x1fc   :  { %v3367_v47 = vpop.eup %3366  ;;  %3114 = vmatprep.mubr.msk.f32.mxu1 %vm101_vm0, %v3365_v45  ;;  %v1313_v61 = vadd.f32 %v4084_v62, %v4164_v29 }
 0x1fd   :  { %3376 = vtanh.f32 %v476_v46  ;;  %v3096_v48 = vpop.f32.mrb[18].mxu1  ;;  %3115 = vmatmul.mubr.msk.f32.gmra.mrb[26].mxu1 %vm101_vm0, %v3367_v47  ;;  %v1308_v46 = vadd.f32 %v4164_v29, %v4086_v63  ;;  %v1303_v47 = vadd.f32 %v4080_v60, %v4164_v29  ;;  %v1318_v63 = vadd.f32 %v4164_v29, %v4090_v1 }
 0x1fe   :  { %3378 = vtanh.f32 %v481_v43  ;;  %v491_v49 = vadd.f32 %v3096_v48, %v4137_v23  ;;  %v485_v50 = vpop.f32.mrb[19].mxu1  ;;  %v1328_v60 = vadd.f32 %v4164_v29, %v4094_v3  ;;  %v1333_v1 = vadd.f32 %v4092_v2, %v4164_v29 }
 0x1ff   :  { %v3369_v20 = vpop.eup %3368  ;;  %v486_v21 = vadd.f32 %v4137_v23, %v485_v50  ;;  %v1338_v3 = vadd.f32 %v4164_v29, %v4098_v5  ;;  %v1353_v5 = vadd.f32 %v4100_v6, %v4164_v29 }
 0x200   :  { %v3371_v22 = vpop.eup %3370  ;;  %3117 = vmatprep.mubr.msk.f32.mxu1 %vm101_vm0, %v3369_v20  ;;  %v1323_v20 = vadd.f32 %v4088_v0, %v4164_v29  ;;  %v1348_v0 = vadd.f32 %v4164_v29, %v4102_v7  ;;  %v1358_v7 = vadd.f32 %v4164_v29, %v4106_v9  ;;  %v1373_v9 = vadd.f32 %v4108_v10, %v4164_v29 }
 0x201   :  { %3380 = vtanh.f32 %v486_v21  ;;  %v3099_v51 = vpop.f32.mrb[20].mxu1  ;;  %3118 = vmatmul.mubr.msk.f32.gmra.mrb[28].mxu1 %vm101_vm0, %v3371_v22 }
 0x202   :  { %3382 = vtanh.f32 %v491_v49  ;;  %v501_v24 = vadd.f32 %v3099_v51, %v4137_v23  ;;  %v495_v25 = vpop.f32.mrb[21].mxu1 }
 0x203   :  { %v3373_v26 = vpop.eup %3372  ;;  %v496_v27 = vadd.f32 %v4137_v23, %v495_v25 }
 0x204   :  { %v3375_v28 = vpop.eup %3374  ;;  %3120 = vmatprep.mubr.msk.f32.mxu1 %vm101_vm0, %v3373_v26 }
 0x205   :  { %3384 = vtanh.f32 %v496_v27  ;;  %v3102_v30 = vpop.f32.mrb[22].mxu1  ;;  %3121 = vmatmul.mubr.msk.f32.gmra.mrb[30].mxu1 %vm101_vm0, %v3375_v28  ;;  %v1363_v28 = vadd.f32 %v4104_v8, %v4164_v29  ;;  %v1388_v8 = vadd.f32 %v4164_v29, %v4118_v15 }
 0x206   :  { %3386 = vtanh.f32 %v501_v24  ;;  %v511_v31 = vadd.f32 %v3102_v30, %v4137_v23  ;;  %v505_v32 = vpop.f32.mrb[23].mxu1  ;;  %v1343_v24 = vadd.f32 %v4096_v4, %v4164_v29  ;;  %v1368_v4 = vadd.f32 %v4164_v29, %v4110_v11 }
 0x207   :  { %v3377_v33 = vpop.eup %3376  ;;  %v506_v36 = vadd.f32 %v4137_v23, %v505_v32  ;;  %v1378_v11 = vadd.f32 %v4164_v29, %v4114_v13  ;;  %v1398_v13 = vadd.f32 %v4164_v29, %v4122_v17 }
 0x208   :  { %v3379_v37 = vpop.eup %3378  ;;  %3123 = vmatprep.mubr.msk.f32.mxu1 %vm101_vm0, %v3377_v33  ;;  %v1383_v33 = vadd.f32 %v4112_v12, %v4164_v29  ;;  %v1408_v12 = vadd.f32 %v4164_v29, %v4126_v19 }
 0x209   :  { %3388 = vtanh.f32 %v506_v36  ;;  %3124 = vmatmul.mubr.msk.f32.gmra.mrb[32].mxu1 %vm101_vm0, %v3379_v37  ;;  %v1393_v36 = vadd.f32 %v4116_v14, %v4164_v29  ;;  %v1413_v14 = vadd.f32 %v4124_v18, %v4164_v29 }
 0x20a   :  { %3390 = vtanh.f32 %v511_v31 }
 0x20b   :  { %v3381_v39 = vpop.eup %3380  ;;  %3392 = vtanh.f32 %v1258_v35 }
 0x20c   :  { %v3383_v40 = vpop.eup %3382  ;;  %3126 = vmatprep.mubr.msk.f32.mxu1 %vm101_vm0, %v3381_v39  ;;  %3394 = vtanh.f32 %v1268_v38  ;;  %v1403_v38 = vadd.f32 %v4120_v16, %v4164_v29 }
 0x20d   :  { %3127 = vmatmul.mubr.msk.f32.gmra.mrb[34].mxu1 %vm101_vm0, %v3383_v40  ;;  %3396 = vtanh.f32 %v1263_v34 }
 0x20e   :  { %3398 = vtanh.f32 %v1273_v53 }
 0x20f   :  { %v3385_v23 = vpop.eup %3384  ;;  %3400 = vtanh.f32 %v1278_v55 }
 0x210   :  { %v3387_v41 = vpop.eup %3386  ;;  %3129 = vmatprep.mubr.msk.f32.mxu1 %vm101_vm0, %v3385_v23  ;;  %3402 = vtanh.f32 %v1288_v52 }
 0x211   :  { %3130 = vmatmul.mubr.msk.f32.gmra.mrb[36].mxu1 %vm101_vm0, %v3387_v41  ;;  %3404 = vtanh.f32 %v1283_v42 }
 0x212   :  { %3406 = vtanh.f32 %v1293_v57 }
 0x213   :  { %v3389_v43 = vpop.eup %3388  ;;  %3408 = vtanh.f32 %v1298_v56 }
 0x214   :  { %v3391_v54 = vpop.eup %3390  ;;  %3132 = vmatprep.mubr.msk.f32.mxu1 %vm101_vm0, %v3389_v43  ;;  %3410 = vtanh.f32 %v1308_v46 }
 0x215   :  { %v3393_v44 = vpop.eup %3392  ;;  %3133 = vmatmul.mubr.msk.f32.gmra.mrb[38].mxu1 %vm101_vm0, %v3391_v54  ;;  %3412 = vtanh.f32 %v1303_v47 }
 0x216   :  { %3189 = vmatprep.mubr.msk.f32.mxu1 %vm1456_vm2, %v3393_v44  ;;  %v3395_v59 = vpop.eup %3394  ;;  %3414 = vtanh.f32 %v1313_v61 }
 0x217   :  { %v3397_v45 = vpop.eup %3396  ;;  %3416 = vtanh.f32 %v1318_v63 }
 0x218   :  { %v3399_v58 = vpop.eup %3398  ;;  %3418 = vtanh.f32 %v1328_v60 }
 0x219   :  { %3190 = vmatmul.mubr.msk.f32.vlgmr.msra.gmra.mrb[40].mxu1 %vm1456_vm2, %v3397_v45  ;;  %v3401_v48 = vpop.eup %3400  ;;  %3420 = vtanh.f32 %v1323_v20 }
 0x21a   :  { %3192 = vmatprep.mubr.msk.f32.mxu1 %vm1456_vm2, %v3395_v59  ;;  %v3403_v49 = vpop.eup %3402  ;;  %3422 = vtanh.f32 %v1333_v1 }
 0x21b   :  { %v3405_v50 = vpop.eup %3404  ;;  %3424 = vtanh.f32 %v1338_v3 }
 0x21c   :  { %v3407_v62 = vpop.eup %3406  ;;  %3426 = vtanh.f32 %v1348_v0 }
 0x21d   :  { %3193 = vmatmul.mubr.msk.f32.gmra.mrb[42].mxu1 %vm1456_vm2, %v3399_v58  ;;  %v3409_v21 = vpop.eup %3408  ;;  %3428 = vtanh.f32 %v1343_v24  ;;  %v4301_v58 = vld [vmem:[#allocation5] ss:$0 sm:$0xff] }
 0x21e   :  { %3195 = vmatprep.mubr.msk.f32.mxu1 %vm1456_vm2, %v3401_v48  ;;  %v3411_v22 = vpop.eup %3410  ;;  %3430 = vtanh.f32 %v1353_v5 }
 0x21f   :  { %v3413_v51 = vpop.eup %3412  ;;  %3432 = vtanh.f32 %v1358_v7 }
 0x220   :  { %v3415_v2 = vpop.eup %3414  ;;  %3434 = vtanh.f32 %v1368_v4 }
 0x221   :  { %3196 = vmatmul.mubr.msk.f32.gmra.mrb[44].mxu1 %vm1456_vm2, %v3405_v50  ;;  %v3417_v25 = vpop.eup %3416  ;;  %3436 = vtanh.f32 %v1363_v28  ;;  %v4311_v50 = vld [vmem:[%s4513_s10] ss:$0 sm:$0xff] }
 0x222   :  { %3198 = vmatprep.mubr.msk.f32.mxu1 %vm1456_vm2, %v3403_v49  ;;  %v3419_v26 = vpop.eup %3418  ;;  %3438 = vtanh.f32 %v1373_v9 }
 0x223   :  { %v3421_v27 = vpop.eup %3420  ;;  %3440 = vtanh.f32 %v1378_v11 }
 0x224   :  { %v3423_v6 = vpop.eup %3422  ;;  %3442 = vtanh.f32 %v1388_v8 }
 0x225   :  { %3199 = vmatmul.mubr.msk.f32.gmra.mrb[46].mxu1 %vm1456_vm2, %v3407_v62  ;;  %v3425_v30 = vpop.eup %3424  ;;  %3444 = vtanh.f32 %v1383_v33 }
 0x226   :  { %3201 = vmatprep.mubr.msk.f32.mxu1 %vm1456_vm2, %v3409_v21  ;;  %v3427_v31 = vpop.eup %3426  ;;  %3446 = vtanh.f32 %v1398_v13 }
 0x227   :  { %v3429_v32 = vpop.eup %3428  ;;  %3448 = vtanh.f32 %v1393_v36 }
 0x228   :  { %v3431_v10 = vpop.eup %3430  ;;  %3450 = vtanh.f32 %v1408_v12 }
 0x229   :  { %3202 = vmatmul.mubr.msk.f32.gmra.mrb[48].mxu1 %vm1456_vm2, %v3413_v51  ;;  %v3433_v35 = vpop.eup %3432  ;;  %3452 = vtanh.f32 %v1403_v38 }
 0x22a   :  { %3204 = vmatprep.mubr.msk.f32.mxu1 %vm1456_vm2, %v3411_v22  ;;  %v3435_v15 = vpop.eup %3434  ;;  %3454 = vtanh.f32 %v1413_v14 }
 0x22b   :  { %v3437_v37 = vpop.eup %3436 }
 0x22c   :  { %v3439_v17 = vpop.eup %3438 }
 0x22d   :  { %3205 = vmatmul.mubr.msk.f32.gmra.mrb[50].mxu1 %vm1456_vm2, %v3415_v2  ;;  %v3441_v34 = vpop.eup %3440 }
 0x22e   :  { %3207 = vmatprep.mubr.msk.f32.mxu1 %vm1456_vm2, %v3417_v25  ;;  %v3443_v39 = vpop.eup %3442 }
 0x22f   :  { %v3445_v40 = vpop.eup %3444 }
 0x230   :  { %v3447_v16 = vpop.eup %3446 }
 0x231   :  { %3208 = vmatmul.mubr.msk.f32.gmra.mrb[52].mxu1 %vm1456_vm2, %v3421_v27  ;;  %v3449_v19 = vpop.eup %3448 }
 0x232   :  { %3210 = vmatprep.mubr.msk.f32.mxu1 %vm1456_vm2, %v3419_v26  ;;  %v3451_v18 = vpop.eup %3450 }
 0x233   :  { %v3453_v29 = vpop.eup %3452 }
 0x234   :  { %v3455_v53 = vpop.eup %3454 }
 0x235   :  { %3211 = vmatmul.mubr.msk.f32.gmra.mrb[54].mxu1 %vm1456_vm2, %v3423_v6 }
 0x236   :  { %3213 = vmatprep.mubr.msk.f32.mxu1 %vm1456_vm2, %v3425_v30 }
 0x239   :  { %3214 = vmatmul.mubr.msk.f32.gmra.mrb[56].mxu1 %vm1456_vm2, %v3429_v32 }
 0x23a   :  { %3216 = vmatprep.mubr.msk.f32.mxu1 %vm1456_vm2, %v3427_v31 }
 0x23d   :  { %3217 = vmatmul.mubr.msk.f32.gmra.mrb[58].mxu1 %vm1456_vm2, %v3431_v10 }
 0x23e   :  { %3219 = vmatprep.mubr.msk.f32.mxu1 %vm1456_vm2, %v3433_v35 }
 0x241   :  { %3220 = vmatmul.mubr.msk.f32.gmra.mrb[60].mxu1 %vm1456_vm2, %v3437_v37 }
 0x242   :  { %3222 = vmatprep.mubr.msk.f32.mxu1 %vm1456_vm2, %v3435_v15 }
 0x245   :  { %3223 = vmatmul.mubr.msk.f32.gmra.mrb[62].mxu1 %vm1456_vm2, %v3439_v17 }
 0x246   :  { %3225 = vmatprep.mubr.msk.f32.mxu1 %vm1456_vm2, %v3441_v34 }
 0x249   :  { %3226 = vmatmul.mubr.msk.f32.gmra.mrb[64].mxu1 %vm1456_vm2, %v3445_v40 }
 0x24a   :  { %3228 = vmatprep.mubr.msk.f32.mxu1 %vm1456_vm2, %v3443_v39 }
 0x24d   :  { %3229 = vmatmul.mubr.msk.f32.gmra.mrb[66].mxu1 %vm1456_vm2, %v3449_v19 }
 0x24e   :  { %3231 = vmatprep.mubr.msk.f32.mxu1 %vm1456_vm2, %v3447_v16 }
 0x251   :  { %3232 = vmatmul.mubr.msk.f32.gmra.mrb[68].mxu1 %vm1456_vm2, %v3453_v29 }
 0x252   :  { %3234 = vmatprep.mubr.msk.f32.mxu1 %vm1456_vm2, %v3451_v18 }
 0x255   :  { %3235 = vmatmul.mubr.msk.f32.gmra.mrb[70].mxu1 %vm1456_vm2, %v3455_v53 }
 0x2cc   :  { %v4273_v23 = vpop.f32.mrb[24].mxu1 }
 0x2cd   :  { %v4275_v55 = vpop.f32.mrb[25].mxu1 }
 0x2d0   :  { %v4277_v41 = vpop.f32.mrb[26].mxu1 }
 0x2d1   :  { %v4279_v52 = vpop.f32.mrb[27].mxu1 }
 0x2d4   :  { %v4281_v42 = vpop.f32.mrb[28].mxu1 }
 0x2d5   :  { %v4283_v43 = vpop.f32.mrb[29].mxu1 }
 0x2d8   :  { %v4285_v54 = vpop.f32.mrb[30].mxu1 }
 0x2d9   :  { %v4287_v44 = vpop.f32.mrb[31].mxu1 }
 0x2dc   :  { %v4289_v57 = vpop.f32.mrb[32].mxu1 }
 0x2dd   :  { %v4291_v59 = vpop.f32.mrb[33].mxu1 }
 0x2e0   :  { %v4293_v56 = vpop.f32.mrb[34].mxu1 }
 0x2e1   :  { %v4295_v45 = vpop.f32.mrb[35].mxu1 }
 0x2e4   :  { %v4297_v46 = vpop.f32.mrb[36].mxu1 }
 0x2e5   :  { %v4299_v47 = vpop.f32.mrb[37].mxu1 }
 0x2e8   :  { %v3134_v48 = vpop.f32.mrb[38].mxu1 }
 0x2e9   :  { %v4304_v61 = vadd.f32 %v3134_v48, %v4301_v58  ;;  %v4306_v49 = vpop.f32.mrb[39].mxu1 }
 0x2ec   :  { %v3191_v63 = vpop.f32.mrb[40].mxu1 }
 0x2ed   :  { %v1619_v60 = vpop.f32.mrb[41].mxu1  ;;  %v1625_v21 = vadd.f32 %v3191_v63, %v4311_v50 }
 0x2ee   :  { %v1620_v20 = vadd.f32 %v4311_v50, %v1619_v60 }
 0x2f0   :  { %v3194_v62 = vpop.f32.mrb[42].mxu1  ;;  %3456 = vtanh.f32 %v1620_v20 }
 0x2f1   :  { %v1629_v1 = vpop.f32.mrb[43].mxu1  ;;  %3458 = vtanh.f32 %v1625_v21  ;;  %v1635_v0 = vadd.f32 %v3194_v62, %v4311_v50 }
 0x2f2   :  { %v1630_v3 = vadd.f32 %v4311_v50, %v1629_v1 }
 0x2f4   :  { %v3197_v22 = vpop.f32.mrb[44].mxu1  ;;  %3460 = vtanh.f32 %v1630_v3 }
 0x2f5   :  { %v1639_v51 = vpop.f32.mrb[45].mxu1  ;;  %3462 = vtanh.f32 %v1635_v0  ;;  %v1645_v5 = vadd.f32 %v3197_v22, %v4311_v50 }
 0x2f6   :  { %v1640_v24 = vadd.f32 %v4311_v50, %v1639_v51 }
 0x2f8   :  { %v3200_v2 = vpop.f32.mrb[46].mxu1  ;;  %3464 = vtanh.f32 %v1640_v24 }
 0x2f9   :  { %v1649_v25 = vpop.f32.mrb[47].mxu1  ;;  %3466 = vtanh.f32 %v1645_v5  ;;  %v1655_v28 = vadd.f32 %v3200_v2, %v4311_v50 }
 0x2fa   :  { %v1650_v26 = vadd.f32 %v4311_v50, %v1649_v25  ;;  %v3457_v4 = vpop.eup %3456 }
 0x2fb   :  { %v3459_v30 = vpop.eup %3458  ;;  %3241 = vmatprep.mubr.msk.f32.mxu0 %vm320_vm1, %v3457_v4 }
 0x2fc   :  { %v3203_v7 = vpop.f32.mrb[48].mxu1  ;;  %3468 = vtanh.f32 %v1650_v26  ;;  %3242 = vmatmul.mubr.msk.f32.vlgmr.msra.gmra.mrb[40].mxu0 %vm320_vm1, %v3459_v30 }
 0x2fd   :  { %v1659_v27 = vpop.f32.mrb[49].mxu1  ;;  %v1665_v11 = vadd.f32 %v3203_v7, %v4311_v50 }
 0x2fe   :  { %v1660_v6 = vadd.f32 %v4311_v50, %v1659_v27  ;;  %v3461_v8 = vpop.eup %3460 }
 0x2ff   :  { %v3463_v33 = vpop.eup %3462  ;;  %3244 = vmatprep.mubr.msk.f32.mxu0 %vm320_vm1, %v3461_v8 }
 0x300   :  { %v3206_v9 = vpop.f32.mrb[50].mxu1  ;;  %3470 = vtanh.f32 %v1660_v6  ;;  %3245 = vmatmul.mubr.msk.f32.gmra.mrb[42].mxu0 %vm320_vm1, %v3463_v33 }
 0x301   :  { %v1669_v31 = vpop.f32.mrb[51].mxu1  ;;  %3472 = vtanh.f32 %v1655_v28  ;;  %v1675_v36 = vadd.f32 %v3206_v9, %v4311_v50 }
 0x302   :  { %v1670_v32 = vadd.f32 %v4311_v50, %v1669_v31  ;;  %v3465_v35 = vpop.eup %3464 }
 0x303   :  { %3247 = vmatprep.mubr.msk.f32.mxu0 %vm320_vm1, %v3465_v35  ;;  %v3467_v37 = vpop.eup %3466 }
 0x304   :  { %v3209_v10 = vpop.f32.mrb[52].mxu1  ;;  %3474 = vtanh.f32 %v1670_v32  ;;  %3248 = vmatmul.mubr.msk.f32.gmra.mrb[44].mxu0 %vm320_vm1, %v3467_v37 }
 0x305   :  { %v1679_v13 = vpop.f32.mrb[53].mxu1  ;;  %3476 = vtanh.f32 %v1665_v11  ;;  %v1685_v14 = vadd.f32 %v3209_v10, %v4311_v50 }
 0x306   :  { %v1680_v15 = vadd.f32 %v4311_v50, %v1679_v13  ;;  %v3469_v38 = vpop.eup %3468 }
 0x307   :  { %3250 = vmatprep.mubr.msk.f32.mxu0 %vm320_vm1, %v3469_v38 }
 0x308   :  { %v3212_v12 = vpop.f32.mrb[54].mxu1  ;;  %3478 = vtanh.f32 %v1680_v15 }
 0x309   :  { %v1689_v17 = vpop.f32.mrb[55].mxu1  ;;  %3480 = vtanh.f32 %v1675_v36  ;;  %v1695_v18 = vadd.f32 %v3212_v12, %v4311_v50 }
 0x30a   :  { %v1690_v34 = vadd.f32 %v4311_v50, %v1689_v17  ;;  %v3471_v39 = vpop.eup %3470 }
 0x30b   :  { %v3473_v40 = vpop.eup %3472 }
 0x30c   :  { %v3215_v16 = vpop.f32.mrb[56].mxu1  ;;  %3251 = vmatmul.mubr.msk.f32.gmra.mrb[46].mxu0 %vm320_vm1, %v3473_v40  ;;  %3482 = vtanh.f32 %v1690_v34 }
 0x30d   :  { %v1699_v19 = vpop.f32.mrb[57].mxu1  ;;  %3484 = vtanh.f32 %v1685_v14  ;;  %3253 = vmatprep.mubr.msk.f32.mxu0 %vm320_vm1, %v3471_v39  ;;  %v1705_v20 = vadd.f32 %v3215_v16, %v4311_v50 }
 0x30e   :  { %v1700_v29 = vadd.f32 %v4311_v50, %v1699_v19  ;;  %v3475_v53 = vpop.eup %3474 }
 0x30f   :  { %v3477_v48 = vpop.eup %3476 }
 0x310   :  { %v3218_v63 = vpop.f32.mrb[58].mxu1  ;;  %3254 = vmatmul.mubr.msk.f32.gmra.mrb[48].mxu0 %vm320_vm1, %v3477_v48  ;;  %3486 = vtanh.f32 %v1700_v29 }
 0x311   :  { %v1709_v60 = vpop.f32.mrb[59].mxu1  ;;  %3488 = vtanh.f32 %v1695_v18  ;;  %3256 = vmatprep.mubr.msk.f32.mxu0 %vm320_vm1, %v3475_v53  ;;  %v1715_v51 = vadd.f32 %v3218_v63, %v4311_v50 }
 0x312   :  { %v1710_v62 = vadd.f32 %v4311_v50, %v1709_v60  ;;  %v3479_v21 = vpop.eup %3478 }
 0x313   :  { %v3481_v1 = vpop.eup %3480 }
 0x314   :  { %v3221_v22 = vpop.f32.mrb[60].mxu1  ;;  %3257 = vmatmul.mubr.msk.f32.gmra.mrb[50].mxu0 %vm320_vm1, %v3481_v1  ;;  %3490 = vtanh.f32 %v1710_v62  ;;  %v4380_v62 = vld [vmem:[%s4515_s12] ss:$0 sm:$0xff]  ;;  %s3829_s12 = smov [#allocation8]  }
 0x315   :  { %v1719_v3 = vpop.f32.mrb[61].mxu1  ;;  %3492 = vtanh.f32 %v1705_v20  ;;  %3259 = vmatprep.mubr.msk.f32.mxu0 %vm320_vm1, %v3479_v21  ;;  %v1725_v26 = vadd.f32 %v3221_v22, %v4311_v50  ;;  %s2669_s21 = sshll.u32 %s3829_s12, 4  ;;  %s2670_s21 = int_to_ptr.vmem [resolvable:$true] %s2669_s21 }
 0x316   :  { %v1720_v0 = vadd.f32 %v4311_v50, %v1719_v3  ;;  %v3483_v24 = vpop.eup %3482  ;;  %s3773_s22 = scalar_lea.vmem %s2670_s21, 2048  ;;  %p3778_p3 = scmp.lt.s32.totalorder %s2670_s21, %s2670_s21 }
 0x317   :  { %v3485_v2 = vpop.eup %3484  ;;  %p3774_p2 = scmp.ne.s32.totalorder %s2670_s21, %s3773_s22  ;;  %p3779_p4 = scmp.lt.s32.totalorder %s3773_s22, %s3773_s22 }
 0x318   :  { %v3224_v25 = vpop.f32.mrb[62].mxu1  ;;  %3260 = vmatmul.mubr.msk.f32.gmra.mrb[52].mxu0 %vm320_vm1, %v3485_v2  ;;  %3494 = vtanh.f32 %v1720_v0 }
 0x319   :  { %v1729_v5 = vpop.f32.mrb[63].mxu1  ;;  %3496 = vtanh.f32 %v1715_v51  ;;  %3262 = vmatprep.mubr.msk.f32.mxu0 %vm320_vm1, %v3483_v24  ;;  %v1735_v30 = vadd.f32 %v3224_v25, %v4311_v50  ;;  %p3780_p5 = por %p3779_p4, %p3778_p3 }
 0x31a   :  { %v1730_v7 = vadd.f32 %v4311_v50, %v1729_v5  ;;  %v3487_v27 = vpop.eup %3486 }
 0x31b   :  { %v3489_v4 = vpop.eup %3488  ;;  %p3781_p6 = pnand %p3780_p5, %p3774_p2 }
 0x31c   :  { %v3227_v28 = vpop.f32.mrb[64].mxu1  ;;  %3263 = vmatmul.mubr.msk.f32.gmra.mrb[54].mxu0 %vm320_vm1, %v3489_v4  ;;  %3498 = vtanh.f32 %v1730_v7 }
 0x31d   :  { %v1739_v6 = vpop.f32.mrb[65].mxu1  ;;  %3500 = vtanh.f32 %v1725_v26  ;;  %3265 = vmatprep.mubr.msk.f32.mxu0 %vm320_vm1, %v3487_v27  ;;  %v1745_v33 = vadd.f32 %v3227_v28, %v4311_v50 }
 0x31e   :  { %v1740_v9 = vadd.f32 %v4311_v50, %v1739_v6  ;;  %v3491_v31 = vpop.eup %3490 }
 0x31f   :  { %v3493_v11 = vpop.eup %3492 }
 0x320   :  { %v3230_v32 = vpop.f32.mrb[66].mxu1  ;;  %3266 = vmatmul.mubr.msk.f32.gmra.mrb[56].mxu0 %vm320_vm1, %v3493_v11  ;;  %3502 = vtanh.f32 %v1740_v9 }
 0x321   :  { %v1749_v8 = vpop.f32.mrb[67].mxu1  ;;  %3504 = vtanh.f32 %v1735_v30  ;;  %3268 = vmatprep.mubr.msk.f32.mxu0 %vm320_vm1, %v3491_v31  ;;  %v1755_v37 = vadd.f32 %v3230_v32, %v4311_v50 }
 0x322   :  { %v1750_v10 = vadd.f32 %v4311_v50, %v1749_v8  ;;  %v3495_v35 = vpop.eup %3494 }
 0x323   :  { %v3497_v13 = vpop.eup %3496 }
 0x324   :  { %v3233_v36 = vpop.f32.mrb[68].mxu1  ;;  %3269 = vmatmul.mubr.msk.f32.gmra.mrb[58].mxu0 %vm320_vm1, %v3497_v13  ;;  %3506 = vtanh.f32 %v1750_v10 }
 0x325   :  { %v1759_v15 = vpop.f32.mrb[69].mxu1  ;;  %3508 = vtanh.f32 %v1745_v33  ;;  %3271 = vmatprep.mubr.msk.f32.mxu0 %vm320_vm1, %v3495_v35  ;;  %v1765_v39 = vadd.f32 %v3233_v36, %v4311_v50 }
 0x326   :  { %v1760_v12 = vadd.f32 %v4311_v50, %v1759_v15  ;;  %v3499_v38 = vpop.eup %3498 }
 0x327   :  { %v3501_v17 = vpop.eup %3500 }
 0x328   :  { %v3236_v14 = vpop.f32.mrb[70].mxu1  ;;  %3272 = vmatmul.mubr.msk.f32.gmra.mrb[60].mxu0 %vm320_vm1, %v3501_v17  ;;  %3510 = vtanh.f32 %v1760_v12 }
 0x329   :  { %v1769_v34 = vpop.f32.mrb[71].mxu1  ;;  %3512 = vtanh.f32 %v1755_v37  ;;  %3274 = vmatprep.mubr.msk.f32.mxu0 %vm320_vm1, %v3499_v38  ;;  %v1775_v18 = vadd.f32 %v3236_v14, %v4311_v50 }
 0x32a   :  { %v1770_v40 = vadd.f32 %v4311_v50, %v1769_v34  ;;  %v3503_v16 = vpop.eup %3502 }
 0x32b   :  { %v3505_v19 = vpop.eup %3504 }
 0x32c   :  { %3275 = vmatmul.mubr.msk.f32.gmra.mrb[62].mxu0 %vm320_vm1, %v3505_v19  ;;  %3514 = vtanh.f32 %v1770_v40 }
 0x32d   :  { %3516 = vtanh.f32 %v1765_v39  ;;  %3277 = vmatprep.mubr.msk.f32.mxu0 %vm320_vm1, %v3503_v16 }
 0x32e   :  { %v3507_v29 = vpop.eup %3506  ;;  %3518 = vtanh.f32 %v1775_v18 }
 0x32f   :  { %v3509_v53 = vpop.eup %3508 }
 0x330   :  { %3278 = vmatmul.mubr.msk.f32.gmra.mrb[64].mxu0 %vm320_vm1, %v3509_v53 }
 0x331   :  { %3280 = vmatprep.mubr.msk.f32.mxu0 %vm320_vm1, %v3507_v29 }
 0x332   :  { %v3511_v48 = vpop.eup %3510 }
 0x333   :  { %v3513_v63 = vpop.eup %3512 }
 0x334   :  { %3281 = vmatmul.mubr.msk.f32.gmra.mrb[66].mxu0 %vm320_vm1, %v3513_v63 }
 0x335   :  { %3283 = vmatprep.mubr.msk.f32.mxu0 %vm320_vm1, %v3511_v48 }
 0x336   :  { %v3515_v50 = vpop.eup %3514 }
 0x337   :  { %v3517_v60 = vpop.eup %3516 }
 0x338   :  { %3284 = vmatmul.mubr.msk.f32.gmra.mrb[68].mxu0 %vm320_vm1, %v3517_v60  ;;  %v3519_v20 = vpop.eup %3518 }
 0x339   :  { %3286 = vmatprep.mubr.msk.f32.mxu0 %vm320_vm1, %v3515_v50 }
 0x33c   :  { %3287 = vmatmul.mubr.msk.f32.gmra.mrb[70].mxu0 %vm320_vm1, %v3519_v20 }
 0x3cf   :  { %v3243_v21 = vpop.f32.mrb[40].mxu0 }
 0x3d0   :  { %v1987_v1 = vadd.f32 %v3243_v21, %v4380_v62  ;;  %v1981_v22 = vpop.f32.mrb[41].mxu0 }
 0x3d1   :  { %v1982_v3 = vadd.f32 %v4380_v62, %v1981_v22 }
 0x3d2   :  { %v2853_v51 = vmul.f32 -1.442695, %v1987_v1 }
 0x3d3   :  { %v2852_v0 = vmul.f32 -1.442695, %v1982_v3  ;;  %v3246_v24 = vpop.f32.mrb[42].mxu0 }
 0x3d4   :  { %3520 = vpow2.f32 %v2853_v51  ;;  %v1997_v2 = vadd.f32 %v3246_v24, %v4380_v62  ;;  %v1991_v25 = vpop.f32.mrb[43].mxu0 }
 0x3d5   :  { %3522 = vpow2.f32 %v2852_v0  ;;  %v1992_v5 = vadd.f32 %v4380_v62, %v1991_v25 }
 0x3d6   :  { %v2855_v26 = vmul.f32 -1.442695, %v1997_v2 }
 0x3d7   :  { %v2854_v7 = vmul.f32 -1.442695, %v1992_v5  ;;  %v3249_v27 = vpop.f32.mrb[44].mxu0 }
 0x3d8   :  { %3524 = vpow2.f32 %v2855_v26  ;;  %v2007_v4 = vadd.f32 %v3249_v27, %v4380_v62  ;;  %v2001_v28 = vpop.f32.mrb[45].mxu0 }
 0x3d9   :  { %3526 = vpow2.f32 %v2854_v7  ;;  %v2002_v6 = vadd.f32 %v4380_v62, %v2001_v28 }
 0x3da   :  { %v2857_v30 = vmul.f32 -1.442695, %v2007_v4 }
 0x3db   :  { %v2856_v9 = vmul.f32 -1.442695, %v2002_v6 }
 0x3dc   :  { %3528 = vpow2.f32 %v2857_v30 }
 0x3dd   :  { %3530 = vpow2.f32 %v2856_v9 }
 0x3de   :  { %v3521_v8 = vpop.eup %3520 }
 0x3df   :  { %v3252_v31 = vpop.f32.mrb[46].mxu0  ;;  %v3523_v10 = vpop.eup %3522  ;;  %v2237_v38 = vadd.f32 1.0, %v3521_v8 }
 0x3e0   :  { %v2017_v11 = vadd.f32 %v3252_v31, %v4380_v62  ;;  %v2011_v32 = vpop.f32.mrb[47].mxu0  ;;  %v2236_v13 = vadd.f32 1.0, %v3523_v10 }
 0x3e1   :  { %v2012_v33 = vadd.f32 %v4380_v62, %v2011_v32 }
 0x3e2   :  { %v2859_v35 = vmul.f32 -1.442695, %v2017_v11  ;;  %3532 = vrcp.f32 %v2236_v13  ;;  %v3525_v14 = vpop.eup %3524 }
 0x3e3   :  { %v2858_v36 = vmul.f32 -1.442695, %v2012_v33  ;;  %v3255_v15 = vpop.f32.mrb[48].mxu0  ;;  %v3527_v39 = vpop.eup %3526  ;;  %v2239_v19 = vadd.f32 1.0, %v3525_v14 }
 0x3e4   :  { %v2027_v37 = vadd.f32 %v3255_v15, %v4380_v62  ;;  %v2021_v12 = vpop.f32.mrb[49].mxu0  ;;  %3534 = vpow2.f32 %v2859_v35  ;;  %v2238_v29 = vadd.f32 1.0, %v3527_v39 }
 0x3e5   :  { %v2022_v17 = vadd.f32 %v4380_v62, %v2021_v12  ;;  %3536 = vpow2.f32 %v2858_v36 }
 0x3e6   :  { %v2861_v34 = vmul.f32 -1.442695, %v2027_v37  ;;  %v3529_v48 = vpop.eup %3528 }
 0x3e7   :  { %v2860_v40 = vmul.f32 -1.442695, %v2022_v17  ;;  %v3258_v16 = vpop.f32.mrb[50].mxu0  ;;  %v3531_v63 = vpop.eup %3530  ;;  %v2241_v51 = vadd.f32 1.0, %v3529_v48 }
 0x3e8   :  { %3538 = vpow2.f32 %v2861_v34  ;;  %v2031_v18 = vpop.f32.mrb[51].mxu0  ;;  %v2037_v50 = vadd.f32 %v3258_v16, %v4380_v62  ;;  %v2240_v21 = vadd.f32 1.0, %v3531_v63 }
 0x3e9   :  { %3540 = vrcp.f32 %v2237_v38  ;;  %v2032_v53 = vadd.f32 %v4380_v62, %v2031_v18 }
 0x3ea   :  { %3542 = vpow2.f32 %v2860_v40  ;;  %v2863_v2 = vmul.f32 -1.442695, %v2037_v50 }
 0x3eb   :  { %v2862_v60 = vmul.f32 -1.442695, %v2032_v53  ;;  %v3261_v20 = vpop.f32.mrb[52].mxu0  ;;  %3544 = vrcp.f32 %v2239_v19 }
 0x3ec   :  { %v2047_v1 = vadd.f32 %v3261_v20, %v4380_v62  ;;  %v2041_v22 = vpop.f32.mrb[53].mxu0  ;;  %3546 = vrcp.f32 %v2238_v29  ;;  %v3533_v24 = vpop.eup %3532 }
 0x3ed   :  { %v2042_v3 = vadd.f32 %v4380_v62, %v2041_v22  ;;  %3548 = vrcp.f32 %v2240_v21  ;;  %2332 = vxpose.xlu0.b32.start [1/4] (short) (narrow) %v3533_v24, 16 }
 0x3ee   :  { %v2865_v0 = vmul.f32 -1.442695, %v2047_v1  ;;  %3550 = vpow2.f32 %v2862_v60  ;;  %v3535_v26 = vpop.eup %3534 }
 0x3ef   :  { %v2864_v25 = vmul.f32 -1.442695, %v2042_v3  ;;  %v3264_v5 = vpop.f32.mrb[54].mxu0  ;;  %v3537_v4 = vpop.eup %3536  ;;  %v2243_v28 = vadd.f32 1.0, %v3535_v26 }
 0x3f0   :  { %3552 = vpow2.f32 %v2865_v0  ;;  %v2057_v7 = vadd.f32 %v3264_v5, %v4380_v62  ;;  %v2051_v27 = vpop.f32.mrb[55].mxu0  ;;  %v2242_v9 = vadd.f32 1.0, %v3537_v4 }
 0x3f1   :  { %3554 = vpow2.f32 %v2864_v25  ;;  %v2052_v6 = vadd.f32 %v4380_v62, %v2051_v27 }
 0x3f2   :  { %v3539_v30 = vpop.eup %3538  ;;  %3556 = vrcp.f32 %v2241_v51  ;;  %v2867_v31 = vmul.f32 -1.442695, %v2057_v7 }
 0x3f3   :  { %v3541_v11 = vpop.eup %3540  ;;  %3558 = vpow2.f32 %v2863_v2  ;;  %v2866_v32 = vmul.f32 -1.442695, %v2052_v6  ;;  %v3267_v8 = vpop.f32.mrb[56].mxu0  ;;  %v2245_v13 = vadd.f32 1.0, %v3539_v30 }
 0x3f4   :  { %3560 = vrcp.f32 %v2243_v28  ;;  %v2067_v33 = vadd.f32 %v3267_v8, %v4380_v62  ;;  %v2061_v10 = vpop.f32.mrb[57].mxu0  ;;  %2333 = vxpose.xlu0.b32.cont [2/4] (short) (narrow) %v3541_v11, 16  ;;  %v3543_v35 = vpop.eup %3542 }
 0x3f5   :  { %3562 = vrcp.f32 %v2242_v9  ;;  %v2062_v36 = vadd.f32 %v4380_v62, %v2061_v10  ;;  %v3545_v15 = vpop.eup %3544  ;;  %v2244_v37 = vadd.f32 1.0, %v3543_v35 }
 0x3f6   :  { %3564 = vpow2.f32 %v2867_v31  ;;  %v2869_v12 = vmul.f32 -1.442695, %v2067_v33  ;;  %v3547_v38 = vpop.eup %3546 }
 0x3f7   :  { %3566 = vpow2.f32 %v2866_v32  ;;  %v2868_v17 = vmul.f32 -1.442695, %v2062_v36  ;;  %v3270_v14 = vpop.f32.mrb[58].mxu0  ;;  %v3549_v34 = vpop.eup %3548 }
 0x3f8   :  { %3568 = vrcp.f32 %v2244_v37  ;;  %v2077_v39 = vadd.f32 %v3270_v14, %v4380_v62  ;;  %v2071_v40 = vpop.f32.mrb[59].mxu0  ;;  %2334 = vxpose.xlu0.b32.cont [3/4] (short) (narrow) %v3547_v38, 16  ;;  %v3551_v16 = vpop.eup %3550  ;;  %2364 = vxpose.xlu1.b32.start [1/4] (short) (narrow) %v3549_v34, 16 }
 0x3f9   :  { %3570 = vrcp.f32 %v2245_v13  ;;  %v2072_v19 = vadd.f32 %v4380_v62, %v2071_v40  ;;  %v2246_v29 = vadd.f32 1.0, %v3551_v16 }
 0x3fa   :  { %v3553_v18 = vpop.eup %3552  ;;  %3572 = vpow2.f32 %v2869_v12  ;;  %v2871_v63 = vmul.f32 -1.442695, %v2077_v39 }
 0x3fb   :  { %v3555_v53 = vpop.eup %3554  ;;  %v2249_v48 = vadd.f32 1.0, %v3553_v18  ;;  %3574 = vpow2.f32 %v2868_v17  ;;  %v3273_v50 = vpop.f32.mrb[60].mxu0  ;;  %v2870_v21 = vmul.f32 -1.442695, %v2072_v19 }
 0x3fc   :  { %v3557_v60 = vpop.eup %3556  ;;  %3576 = vrcp.f32 %v2246_v29  ;;  %v2248_v20 = vadd.f32 1.0, %v3555_v53  ;;  %v2087_v1 = vadd.f32 %v3273_v50, %v4380_v62  ;;  %v2081_v22 = vpop.f32.mrb[61].mxu0  ;;  %2335 = vxpose.xlu0.b32.end [4/4] (short) (narrow) %v3545_v15, 16 }
 0x3fd   :  { %v3559_v3 = vpop.eup %3558  ;;  %3578 = vrcp.f32 %v2249_v48  ;;  %v2082_v51 = vadd.f32 %v4380_v62, %v2081_v22  ;;  %2365 = vxpose.xlu1.b32.cont [2/4] (short) (narrow) %v3557_v60, 16 }
 0x3fe   :  { %v3561_v0 = vpop.eup %3560  ;;  %3580 = vrcp.f32 %v2248_v20  ;;  %v2873_v24 = vmul.f32 -1.442695, %v2087_v1  ;;  %v2247_v7 = vadd.f32 1.0, %v3559_v3 }
 0x3ff   :  { %v3563_v2 = vpop.eup %3562  ;;  %3582 = vpow2.f32 %v2871_v63  ;;  %v2872_v25 = vmul.f32 -1.442695, %v2082_v51  ;;  %v3276_v5 = vpop.f32.mrb[62].mxu0 }
 0x400   :  { %v3565_v26 = vpop.eup %3564  ;;  %3584 = vpow2.f32 %v2870_v21  ;;  %v2091_v27 = vpop.f32.mrb[63].mxu0  ;;  %v2097_v28 = vadd.f32 %v3276_v5, %v4380_v62 }
 0x401   :  { %v3567_v4 = vpop.eup %3566  ;;  %3586 = vpow2.f32 %v2873_v24  ;;  %v2092_v6 = vadd.f32 %v4380_v62, %v2091_v27  ;;  %2366 = vxpose.xlu1.b32.cont [3/4] (short) (narrow) %v3563_v2, 16  ;;  %v2251_v11 = vadd.f32 1.0, %v3565_v26 }
 0x402   :  { %v3569_v30 = vpop.eup %3568  ;;  %v2250_v9 = vadd.f32 1.0, %v3567_v4  ;;  %3588 = vpow2.f32 %v2872_v25  ;;  %v2875_v36 = vmul.f32 -1.442695, %v2097_v28 }
 0x403   :  { %v3571_v31 = vpop.eup %3570  ;;  %v2874_v32 = vmul.f32 -1.442695, %v2092_v6  ;;  %2396 = vxpose.xlu0.b32.start [1/4] (short) (narrow) %v3569_v30, 16  ;;  %v3279_v8 = vpop.f32.mrb[64].mxu0  ;;  %3590 = vrcp.f32 %v2247_v7 }
 0x404   :  { %v3573_v33 = vpop.eup %3572  ;;  %v2107_v10 = vadd.f32 %v3279_v8, %v4380_v62  ;;  %v2101_v35 = vpop.f32.mrb[65].mxu0  ;;  %3592 = vrcp.f32 %v2250_v9 }
 0x405   :  { %v3575_v13 = vpop.eup %3574  ;;  %v2102_v15 = vadd.f32 %v4380_v62, %v2101_v35  ;;  %2367 = vxpose.xlu1.b32.end [4/4] (short) (narrow) %v3561_v0, 16  ;;  %3594 = vpow2.f32 %v2874_v32  ;;  %v2253_v40 = vadd.f32 1.0, %v3573_v33 }
 0x406   :  { %v3577_v37 = vpop.eup %3576  ;;  %v2252_v12 = vadd.f32 1.0, %v3575_v13  ;;  %3596 = vrcp.f32 %v2251_v11  ;;  %v2877_v17 = vmul.f32 -1.442695, %v2107_v10 }
 0x407   :  { %v3579_v38 = vpop.eup %3578  ;;  %v2876_v14 = vmul.f32 -1.442695, %v2102_v15  ;;  %2397 = vxpose.xlu0.b32.cont [2/4] (short) (narrow) %v3571_v31, 16  ;;  %v3282_v34 = vpop.f32.mrb[66].mxu0 }
 0x408   :  { %v3581_v39 = vpop.eup %3580  ;;  %3598 = vrcp.f32 %v2252_v12  ;;  %v2111_v16 = vpop.f32.mrb[67].mxu0  ;;  %v2117_v63 = vadd.f32 %v3282_v34, %v4380_v62 }
 0x409   :  { %v3583_v19 = vpop.eup %3582  ;;  %3600 = vpow2.f32 %v2875_v36  ;;  %v2112_v18 = vadd.f32 %v4380_v62, %v2111_v16  ;;  %2428 = vxpose.xlu1.b32.start [1/4] (short) (narrow) %v3581_v39, 16 }
 0x40a   :  { %v3585_v29 = vpop.eup %3584  ;;  %v2255_v53 = vadd.f32 1.0, %v3583_v19  ;;  %3602 = vpow2.f32 %v2876_v14  ;;  %v2879_v25 = vmul.f32 -1.442695, %v2117_v63 }
 0x40b   :  { %v3587_v48 = vpop.eup %3586  ;;  %3604 = vpow2.f32 %v2877_v17  ;;  %2398 = vxpose.xlu0.b32.cont [3/4] (short) (narrow) %v3577_v37, 16  ;;  %v3285_v50 = vpop.f32.mrb[68].mxu0  ;;  %v2254_v20 = vadd.f32 1.0, %v3585_v29  ;;  %v2878_v3 = vmul.f32 -1.442695, %v2112_v18 }
 0x40c   :  { %v3589_v60 = vpop.eup %3588  ;;  %3606 = vrcp.f32 %v2253_v40  ;;  %v2127_v21 = vadd.f32 %v3285_v50, %v4380_v62  ;;  %v2121_v1 = vpop.f32.mrb[69].mxu0  ;;  %v2257_v24 = vadd.f32 1.0, %v3587_v48 }
 0x40d   :  { %v2256_v22 = vadd.f32 1.0, %v3589_v60  ;;  %v2122_v51 = vadd.f32 %v4380_v62, %v2121_v1  ;;  %2429 = vxpose.xlu1.b32.cont [2/4] (short) (narrow) %v3579_v38, 16  ;;  %v3591_v0 = vpop.eup %3590  ;;  %3608 = vrcp.f32 %v2255_v53 }
 0x40e   :  { %v3593_v2 = vpop.eup %3592  ;;  %v2881_v7 = vmul.f32 -1.442695, %v2127_v21 }
 0x40f   :  { %3610 = vrcp.f32 %v2256_v22  ;;  %2399 = vxpose.xlu0.b32.end [4/4] (short) (narrow) %v3591_v0, 16  ;;  %v3288_v5 = vpop.f32.mrb[70].mxu0  ;;  %v3595_v26 = vpop.eup %3594  ;;  %v2880_v6 = vmul.f32 -1.442695, %v2122_v51 }
 0x410   :  { %3612 = vrcp.f32 %v2254_v20  ;;  %v2137_v27 = vadd.f32 %v3288_v5, %v4380_v62  ;;  %v2131_v4 = vpop.f32.mrb[71].mxu0  ;;  %v3597_v28 = vpop.eup %3596  ;;  %v2258_v31 = vadd.f32 1.0, %v3595_v26 }
 0x411   :  { %3614 = vpow2.f32 %v2878_v3  ;;  %v2132_v30 = vadd.f32 %v4380_v62, %v2131_v4  ;;  %2430 = vxpose.xlu1.b32.cont [3/4] (short) (narrow) %v3593_v2, 16  ;;  %v656_v2 = vadd.f32 %v4301_v58, %v4275_v55  ;;  %v676_v55 = vadd.f32 %v4301_v58, %v4283_v43 }
 0x412   :  { %v3599_v9 = vpop.eup %3598  ;;  %3616 = vrcp.f32 %v2257_v24  ;;  %v2883_v37 = vmul.f32 -1.442695, %v2137_v27  ;;  %v671_v27 = vadd.f32 %v4277_v41, %v4301_v58 }
 0x413   :  { %v3601_v11 = vpop.eup %3600  ;;  %3618 = vpow2.f32 %v2879_v25  ;;  %2460 = vxpose.xlu0.b32.start [1/4] (short) (narrow) %v3599_v9, 16  ;;  %v2882_v10 = vmul.f32 -1.442695, %v2132_v30  ;;  %v661_v25 = vadd.f32 %v4273_v23, %v4301_v58  ;;  %v2737_v5 = vmul.f32 -1.442695, %v656_v2  ;;  %v3716_v2 = vld [vmem:[#allocation2 + $0x18] sm:$0xff] }
 0x414   :  { %v3603_v32 = vpop.eup %3602  ;;  %3620 = vpow2.f32 %v2881_v7  ;;  %v2259_v13 = vadd.f32 1.0, %v3601_v11  ;;  %v666_v7 = vadd.f32 %v4301_v58, %v4279_v52  ;;  %v681_v9 = vadd.f32 %v4281_v42, %v4301_v58 }
 0x415   :  { %v3605_v8 = vpop.eup %3604  ;;  %v2260_v33 = vadd.f32 1.0, %v3603_v32  ;;  %3622 = vpow2.f32 %v2880_v6  ;;  %2431 = vxpose.xlu1.b32.end [4/4] (short) (narrow) %v3597_v28, 16  ;;  %v2738_v26 = vmul.f32 -1.442695, %v661_v25  ;;  %v2740_v28 = vmul.f32 -1.442695, %v671_v27 }
 0x416   :  { %v3607_v35 = vpop.eup %3606  ;;  %3624 = vrcp.f32 %v2258_v31  ;;  %v2261_v36 = vadd.f32 1.0, %v3605_v8  ;;  %v2739_v4 = vmul.f32 -1.442695, %v666_v7  ;;  %v2741_v31 = vmul.f32 -1.442695, %v676_v55 }
 0x417   :  { %3626 = vrcp.f32 %v2260_v33  ;;  %2461 = vxpose.xlu0.b32.cont [2/4] (short) (narrow) %v3607_v35, 16  ;;  %v3609_v62 = vpop.eup %3608  ;;  %v686_v52 = vadd.f32 %v4301_v58, %v4287_v44  ;;  %v2742_v32 = vmul.f32 -1.442695, %v681_v9  ;;  %v691_v8 = vadd.f32 %v4285_v54, %v4301_v58  ;;  %v3712_v54 = vld [vmem:[#allocation2] sm:$0xff] }
 0x418   :  { %3628 = vpow2.f32 %v2882_v10 }
 0x419   :  { %v3611_v15 = vpop.eup %3610  ;;  %3630 = vrcp.f32 %v2259_v13  ;;  %v2743_v43 = vmul.f32 -1.442695, %v686_v52  ;;  %v2744_v35 = vmul.f32 -1.442695, %v691_v8 }
 0x41a   :  { %v3613_v12 = vpop.eup %3612  ;;  %2492 = vxpose.xlu1.b32.start [1/4] (short) (narrow) %v3611_v15, 16  ;;  %3632 = vrcp.f32 %v2261_v36 }
 0x41b   :  { %v3615_v38 = vpop.eup %3614  ;;  %2462 = vxpose.xlu0.b32.cont [3/4] (short) (narrow) %v3613_v12, 16  ;;  %3634 = vpow2.f32 %v2883_v37 }
 0x41c   :  { %v3617_v17 = vpop.eup %3616  ;;  %v2262_v14 = vadd.f32 1.0, %v3615_v38  ;;  %v701_v38 = vadd.f32 %v4289_v57, %v4301_v58 }
 0x41d   :  { %v3619_v34 = vpop.eup %3618 }
 0x41e   :  { %v3621_v39 = vpop.eup %3620  ;;  %2493 = vxpose.xlu1.b32.cont [2/4] (short) (narrow) %v3617_v17, 16  ;;  %v2263_v19 = vadd.f32 1.0, %v3619_v34  ;;  %3636 = vrcp.f32 %v2262_v14 }
 0x41f   :  { %v3623_v40 = vpop.eup %3622  ;;  %2463 = vxpose.xlu0.b32.end [4/4] (short) (narrow) %v3609_v62, 16  ;;  %v2265_v53 = vadd.f32 1.0, %v3621_v39  ;;  %v696_v62 = vadd.f32 %v4301_v58, %v4291_v59 }
 0x420   :  { %v3625_v16 = vpop.eup %3624  ;;  %v2264_v18 = vadd.f32 1.0, %v3623_v40  ;;  %v706_v40 = vadd.f32 %v4301_v58, %v4295_v45  ;;  %v3715_v58 = vld [vmem:[#allocation2 + $0x10] sm:$0xff] }
 0x421   :  { %v3627_v29 = vpop.eup %3626  ;;  %v2745_v17 = vmul.f32 -1.442695, %v696_v62 }
 0x422   :  { %3638 = vrcp.f32 %v2264_v18  ;;  %2494 = vxpose.xlu1.b32.cont [3/4] (short) (narrow) %v3625_v16, 16  ;;  %v3629_v48 = vpop.eup %3628  ;;  %v3713_v16 = vld [vmem:[#allocation2 + $0x8] sm:$0xff] }
 0x423   :  { %2524 = vxpose.xlu0.b32.start [1/4] (short) (narrow) %v3627_v29, 16  ;;  %3640 = vrcp.f32 %v2263_v19  ;;  %v3631_v63 = vpop.eup %3630  ;;  %v2266_v60 = vadd.f32 1.0, %v3629_v48  ;;  %v2746_v29 = vmul.f32 -1.442695, %v701_v38 }
 0x424   :  { %v3633_v50 = vpop.eup %3632  ;;  %3642 = vrcp.f32 %v2265_v53 }
 0x425   :  { %v3635_v20 = vpop.eup %3634  ;;  %3644 = vrcp.f32 %v2266_v60  ;;  %v2747_v60 = vmul.f32 -1.442695, %v706_v40 }
 0x426   :  { %2495 = vxpose.xlu1.b32.end [4/4] (short) (narrow) %v3631_v63, 16  ;;  %v2267_v1 = vadd.f32 1.0, %v3635_v20  ;;  %v3714_v63 = vld [vmem:[#allocation5] ss:$0 sm:$0xff] }
 0x427   :  { %2525 = vxpose.xlu0.b32.cont [2/4] (short) (narrow) %v3633_v50, 16  ;;  %v711_v50 = vadd.f32 %v3714_v63, %v4293_v56  ;;  %v721_v27 = vadd.f32 %v3714_v63, %v4297_v46  ;;  %v726_v8 = vadd.f32 %v3714_v63, %v4306_v49 }
 0x428   :  { %v3637_v21 = vpop.eup %3636  ;;  %3646 = vrcp.f32 %v2267_v1 }
 0x429   :  { %3648 = vpow2.f32 %v2737_v5 }
 0x42a   :  { %3650 = vpow2.f32 %v2738_v26 }
 0x42b   :  { %2526 = vxpose.xlu0.b32.cont [3/4] (short) (narrow) %v3637_v21, 16  ;;  %3652 = vpow2.f32 %v2739_v4 }
 0x42c   :  { %v3639_v22 = vpop.eup %3638  ;;  %3654 = vpow2.f32 %v2740_v28 }
 0x42d   :  { %2556 = vxpose.xlu1.b32.start [1/4] (short) (narrow) %v3639_v22, 16  ;;  %v3641_v3 = vpop.eup %3640 }
 0x42e   :  { %v3643_v51 = vpop.eup %3642 }
 0x42f   :  { %2527 = vxpose.xlu0.b32.end [4/4] (short) (narrow) %v3641_v3, 16  ;;  %v3645_v0 = vpop.eup %3644 }
 0x431   :  { %2557 = vxpose.xlu1.b32.cont [2/4] (short) (narrow) %v3643_v51, 16  ;;  %v2748_v51 = vmul.f32 -1.442695, %v711_v50 }
 0x432   :  { %v3647_v24 = vpop.eup %3646 }
 0x433   :  { %v3649_v6 = vpop.eup %3648 }
 0x434   :  { %v782_v30 = vadd.f32 1.0, %v3649_v6  ;;  %v3651_v23 = vpop.eup %3650 }
 0x435   :  { %2558 = vxpose.xlu1.b32.cont [3/4] (short) (narrow) %v3645_v0, 16  ;;  %v783_v11 = vadd.f32 1.0, %v3651_v23  ;;  %v3653_v41 = vpop.eup %3652 }
 0x436   :  { %3656 = vrcp.f32 %v782_v30  ;;  %v784_v33 = vadd.f32 1.0, %v3653_v41  ;;  %v3655_v10 = vpop.eup %3654  ;;  %v3717_v30 = vld [vmem:[#allocation2 + $0x20] sm:$0xff] }
 0x437   :  { %3658 = vpow2.f32 %v2741_v31  ;;  %v785_v42 = vadd.f32 1.0, %v3655_v10 }
 0x438   :  { %3660 = vrcp.f32 %v783_v11  ;;  %v2750_v11 = vmul.f32 -1.442695, %v721_v27 }
 0x439   :  { %2559 = vxpose.xlu1.b32.end [4/4] (short) (narrow) %v3647_v24, 16  ;;  %3662 = vpow2.f32 %v2742_v32  ;;  %v716_v24 = vadd.f32 %v3714_v63, %v4299_v47 }
 0x43a   :  { %3664 = vpow2.f32 %v2743_v43  ;;  %v3718_v43 = vld [vmem:[#allocation2 + $0x28] sm:$0xff] }
 0x43b   :  { %3666 = vrcp.f32 %v784_v33  ;;  %v2749_v4 = vmul.f32 -1.442695, %v716_v24 }
 0x43c   :  { %3668 = vpow2.f32 %v2744_v35 }
 0x43d   :  { %3670 = vrcp.f32 %v785_v42 }
 0x43e   :  { %3672 = vpow2.f32 %v2745_v17  ;;  %v2752_v17 = vmul.f32 -1.442695, %v4304_v61 }
 0x440   :  { %v3657_v13 = vpop.eup %3656 }
 0x441   :  { %v3659_v15 = vpop.eup %3658 }
 0x442   :  { %v3661_v12 = vpop.eup %3660  ;;  %v786_v34 = vadd.f32 1.0, %v3659_v15  ;;  %v2751_v15 = vmul.f32 -1.442695, %v726_v8 }
 0x443   :  { %v3663_v59 = vpop.eup %3662 }
 0x444   :  { %v3665_v18 = vpop.eup %3664  ;;  %v787_v48 = vadd.f32 1.0, %v3663_v59  ;;  %3674 = vrcp.f32 %v786_v34 }
 0x445   :  { %v3667_v53 = vpop.eup %3666  ;;  %v788_v21 = vadd.f32 1.0, %v3665_v18  ;;  %3676 = vpow2.f32 %v2746_v29 }
 0x446   :  { %v3669_v45 = vpop.eup %3668  ;;  %3678 = vrcp.f32 %v787_v48 }
 0x447   :  { %v3671_v22 = vpop.eup %3670  ;;  %3680 = vpow2.f32 %v2747_v60  ;;  %v789_v56 = vadd.f32 1.0, %v3669_v45 }
 0x448   :  { %3682 = vrcp.f32 %v788_v21  ;;  %v3673_v5 = vpop.eup %3672  ;;  %v3723_v21 = vld [vmem:[#allocation2 + $0x50] sm:$0xff] }
 0x449   :  { %3684 = vpow2.f32 %v2748_v51  ;;  %v790_v6 = vadd.f32 1.0, %v3673_v5 }
 0x44a   :  { %3686 = vrcp.f32 %v789_v56 }
 0x44b   :  { %3688 = vpow2.f32 %v2749_v4 }
 0x44c   :  { %3690 = vrcp.f32 %v790_v6  ;;  %v3726_v6 = vld [vmem:[#allocation2 + $0x68] sm:$0xff] }
 0x44d   :  { %3692 = vpow2.f32 %v2750_v11 }
 0x44e   :  { %v3675_v26 = vpop.eup %3674 }
 0x44f   :  { %v3677_v55 = vpop.eup %3676 }
 0x450   :  { %v3679_v47 = vpop.eup %3678  ;;  %v791_v46 = vadd.f32 1.0, %v3677_v55 }
 0x451   :  { %v3681_v31 = vpop.eup %3680 }
 0x452   :  { %v3683_v41 = vpop.eup %3682  ;;  %v792_v42 = vadd.f32 1.0, %v3681_v31  ;;  %3694 = vrcp.f32 %v791_v46 }
 0x453   :  { %v3685_v35 = vpop.eup %3684 }
 0x454   :  { %v793_v49 = vadd.f32 1.0, %v3685_v35  ;;  %3696 = vrcp.f32 %v792_v42 }
 0x455   :  { %3698 = vpow2.f32 %v2751_v15 }
 0x456   :  { %3700 = vrcp.f32 %v793_v49 }
 0x457   :  { %3702 = vpow2.f32 %v2752_v17 }
 0x470   :  { %v2348_v44 = vpop.trf.xlu0 }
 0x471   :  { %v2588_v36 = vadd.f32 %v3657_v13, %v2348_v44  ;;  %2636 = vst.msk [vmem:[#allocation8] sm:$0xff] %vm101_vm0, %v2348_v44  ;;  %v3719_v13 = vld [vmem:[#allocation2 + $0x30] sm:$0xff]  ;;  %v3687_v44 = vpop.eup %3686 }
 0x472   :  { %v3689_v38 = vpop.eup %3688 }
 0x473   :  { %v2604_v37 = vmul.f32 %v3712_v54, %v2588_v36  ;;  %v794_v59 = vadd.f32 1.0, %v3689_v38 }
 0x474   :  { %v2349_v14 = vpop.trf.xlu0 }
 0x475   :  { %2620 = vst.msk [vmem:[#allocation7] sm:$0xff] %vm101_vm0, %v2604_v37  ;;  %v2589_v39 = vadd.f32 %v3661_v12, %v2349_v14  ;;  %2637 = vst.msk [vmem:[#allocation8 + $0x8] sm:$0xff] %vm101_vm0, %v2349_v14  ;;  %v3720_v37 = vld [vmem:[#allocation2 + $0x38] sm:$0xff]  ;;  %v3691_v14 = vpop.eup %3690  ;;  %3704 = vrcp.f32 %v794_v59 }
 0x476   :  { %v3693_v40 = vpop.eup %3692 }
 0x477   :  { %v2605_v19 = vmul.f32 %v3713_v16, %v2589_v39  ;;  %v3721_v16 = vld [vmem:[#allocation2 + $0x40] sm:$0xff]  ;;  %v3695_v18 = vpop.eup %3694  ;;  %v795_v61 = vadd.f32 1.0, %v3693_v40 }
 0x478   :  { %v3697_v48 = vpop.eup %3696 }
 0x479   :  { %2621 = vst.msk [vmem:[#allocation7 + $0x8] sm:$0xff] %vm101_vm0, %v2605_v19  ;;  %v2380_v57 = vpop.trf.xlu1  ;;  %3706 = vrcp.f32 %v795_v61 }
 0x47a   :  { %v2590_v20 = vadd.f32 %v3667_v53, %v2380_v57  ;;  %2638 = vst.msk [vmem:[#allocation8 + $0x10] sm:$0xff] %vm101_vm0, %v2380_v57  ;;  %v3722_v57 = vld [vmem:[#allocation2 + $0x48] sm:$0xff] }
 0x47c   :  { %v2606_v1 = vmul.f32 %v3715_v58, %v2590_v20  ;;  %v3699_v20 = vpop.eup %3698 }
 0x47d   :  { %v2381_v3 = vpop.trf.xlu1  ;;  %v3701_v58 = vpop.eup %3700 }
 0x47e   :  { %2622 = vst.msk [vmem:[#allocation7 + $0x10] sm:$0xff] %vm101_vm0, %v2606_v1  ;;  %v2591_v0 = vadd.f32 %v3671_v22, %v2381_v3  ;;  %2639 = vst.msk [vmem:[#allocation8 + $0x18] sm:$0xff] %vm101_vm0, %v2381_v3  ;;  %v796_v22 = vadd.f32 1.0, %v3699_v20  ;;  %v3703_v51 = vpop.eup %3702 }
 0x47f   :  { %v3705_v24 = vpop.eup %3704 }
 0x480   :  { %v2607_v25 = vmul.f32 %v3716_v2, %v2591_v0  ;;  %v3724_v0 = vld [vmem:[#allocation2 + $0x58] sm:$0xff]  ;;  %v797_v2 = vadd.f32 1.0, %v3703_v51  ;;  %3708 = vrcp.f32 %v796_v22 }
 0x482   :  { %2623 = vst.msk [vmem:[#allocation7 + $0x18] sm:$0xff] %vm101_vm0, %v2607_v25  ;;  %3710 = vrcp.f32 %v797_v2 }
 0x483   :  { %v2412_v7 = vpop.trf.xlu0  ;;  %v3707_v27 = vpop.eup %3706 }
 0x484   :  { %v2592_v28 = vadd.f32 %v3675_v26, %v2412_v7  ;;  %2640 = vst.msk [vmem:[#allocation8 + $0x20] sm:$0xff] %vm101_vm0, %v2412_v7  ;;  %v3725_v26 = vld [vmem:[#allocation2 + $0x60] sm:$0xff] }
 0x486   :  { %v2608_v23 = vmul.f32 %v3717_v30, %v2592_v28 }
 0x487   :  { %v2413_v9 = vpop.trf.xlu0 }
 0x488   :  { %2624 = vst.msk [vmem:[#allocation7 + $0x20] sm:$0xff] %vm101_vm0, %v2608_v23  ;;  %v2593_v52 = vadd.f32 %v3679_v47, %v2413_v9  ;;  %2641 = vst.msk [vmem:[#allocation8 + $0x28] sm:$0xff] %vm101_vm0, %v2413_v9  ;;  %v3727_v9 = vld [vmem:[#allocation2 + $0x70] sm:$0xff] }
 0x489   :  { %v2444_v32 = vpop.trf.xlu1 }
 0x48a   :  { %v2609_v33 = vmul.f32 %v3718_v43, %v2593_v52  ;;  %v2594_v10 = vadd.f32 %v3683_v41, %v2444_v32  ;;  %2642 = vst.msk [vmem:[#allocation8 + $0x30] sm:$0xff] %vm101_vm0, %v2444_v32  ;;  %v3709_v30 = vpop.eup %3708 }
 0x48c   :  { %2625 = vst.msk [vmem:[#allocation7 + $0x28] sm:$0xff] %vm101_vm0, %v2609_v33  ;;  %v2610_v62 = vmul.f32 %v3719_v13, %v2594_v10  ;;  %v3711_v11 = vpop.eup %3710 }
 0x48d   :  { %v2445_v36 = vpop.trf.xlu1 }
 0x48e   :  { %2626 = vst.msk [vmem:[#allocation7 + $0x30] sm:$0xff] %vm101_vm0, %v2610_v62  ;;  %v2595_v54 = vadd.f32 %v3687_v44, %v2445_v36  ;;  %2643 = vst.msk [vmem:[#allocation8 + $0x38] sm:$0xff] %vm101_vm0, %v2445_v36 }
 0x490   :  { %v2611_v12 = vmul.f32 %v3720_v37, %v2595_v54 }
 0x492   :  { %2627 = vst.msk [vmem:[#allocation7 + $0x38] sm:$0xff] %vm101_vm0, %v2611_v12 }
 0x493   :  { %v2476_v34 = vpop.trf.xlu0 }
 0x494   :  { %v2596_v39 = vadd.f32 %v3691_v14, %v2476_v34  ;;  %2644 = vst.msk [vmem:[#allocation8 + $0x40] sm:$0xff] %vm101_vm0, %v2476_v34 }
 0x496   :  { %v2612_v19 = vmul.f32 %v3721_v16, %v2596_v39 }
 0x497   :  { %v2477_v29 = vpop.trf.xlu0 }
 0x498   :  { %2628 = vst.msk [vmem:[#allocation7 + $0x40] sm:$0xff] %vm101_vm0, %v2612_v19  ;;  %v2597_v53 = vadd.f32 %v3695_v18, %v2477_v29  ;;  %2645 = vst.msk [vmem:[#allocation8 + $0x48] sm:$0xff] %vm101_vm0, %v2477_v29 }
 0x49a   :  { %v2613_v63 = vmul.f32 %v3722_v57, %v2597_v53  ;;  %v2508_v50 = vpop.trf.xlu1 }
 0x49b   :  { %v2598_v60 = vadd.f32 %v3697_v48, %v2508_v50  ;;  %2646 = vst.msk [vmem:[#allocation8 + $0x50] sm:$0xff] %vm101_vm0, %v2508_v50 }
 0x49c   :  { %2629 = vst.msk [vmem:[#allocation7 + $0x48] sm:$0xff] %vm101_vm0, %v2613_v63 }
 0x49d   :  { %v2614_v45 = vmul.f32 %v3723_v21, %v2598_v60 }
 0x49e   :  { %v2509_v1 = vpop.trf.xlu1 }
 0x49f   :  { %2630 = vst.msk [vmem:[#allocation7 + $0x50] sm:$0xff] %vm101_vm0, %v2614_v45  ;;  %v2599_v3 = vadd.f32 %v3701_v58, %v2509_v1  ;;  %2647 = vst.msk [vmem:[#allocation8 + $0x58] sm:$0xff] %vm101_vm0, %v2509_v1 }
 0x4a1   :  { %v2615_v56 = vmul.f32 %v3724_v0, %v2599_v3 }
 0x4a3   :  { %2631 = vst.msk [vmem:[#allocation7 + $0x58] sm:$0xff] %vm101_vm0, %v2615_v56  ;;  %v2540_v25 = vpop.trf.xlu0 }
 0x4a4   :  { %v2600_v5 = vadd.f32 %v3705_v24, %v2540_v25  ;;  %2648 = vst.msk [vmem:[#allocation8 + $0x60] sm:$0xff] %vm101_vm0, %v2540_v25 }
 0x4a6   :  { %v2616_v7 = vmul.f32 %v3725_v26, %v2600_v5 }
 0x4a7   :  { %v2541_v4 = vpop.trf.xlu0 }
 0x4a8   :  { %2632 = vst.msk [vmem:[#allocation7 + $0x60] sm:$0xff] %vm101_vm0, %v2616_v7  ;;  %v2601_v28 = vadd.f32 %v3707_v27, %v2541_v4  ;;  %2649 = vst.msk [vmem:[#allocation8 + $0x68] sm:$0xff] %vm101_vm0, %v2541_v4 }
 0x4aa   :  { %v2617_v55 = vmul.f32 %v3726_v6, %v2601_v28 }
 0x4ac   :  { %2633 = vst.msk [vmem:[#allocation7 + $0x68] sm:$0xff] %vm101_vm0, %v2617_v55 }
 0x4ad   :  { %v2572_v23 = vpop.trf.xlu1 }
 0x4ae   :  { %v2602_v47 = vadd.f32 %v3709_v30, %v2572_v23  ;;  %2650 = vst.msk [vmem:[#allocation8 + $0x70] sm:$0xff] %vm101_vm0, %v2572_v23 }
 0x4b0   :  { %v2618_v31 = vmul.f32 %v3727_v9, %v2602_v47 }
 0x4b1   :  { %v2573_v52 = vpop.trf.xlu1 }
 0x4b2   :  { %2634 = vst.msk [vmem:[#allocation7 + $0x70] sm:$0xff] %vm101_vm0, %v2618_v31  ;;  %v2603_v41 = vadd.f32 %v3711_v11, %v2573_v52  ;;  %2651 = vst.msk [vmem:[#allocation8 + $0x78] sm:$0xff] %vm101_vm0, %v2573_v52 }
 0x4b3   :  { %3784 = shalt.err (!%p3781_p6)
}
 0x4b4   :  { %s3785_s7 = scalar_lea.hbm %s4517_s14, 2048 }
 0x4b5   :  { %p3786_p7 = scmp.ne.s32.totalorder %s4517_s14, %s3785_s7  ;;  %p3789_p8 = scmp.lt.u32.totalorder %s3785_s7, %s4517_s14 }
 0x4b7   :  { %p3791_p9 = pnand %p3789_p8, %p3786_p7 }
 0x4b9   :  { %3794 = shalt.err (!%p3791_p9)
}
 0x4ba   :  { %2675 = dma.vmem_to_hbm [thread:$0]  %s2670_s21, 2048, %s4517_s14, [#allocation9], %s3826_s23, %s3826_s23, %s3827_s24   ;;  %v3728_v46 = vld [vmem:[#allocation2 + $0x78] sm:$0xff] }
 0x4bb   :  { %v2619_v32 = vmul.f32 %v3728_v46, %v2603_v41  ;;  %s3795_s17 = scalar_lea.vmem %s2658_s30, 2048  ;;  %p3800_p11 = scmp.lt.s32.totalorder %s2658_s30, %s2658_s30 }
 0x4bc   :  { %p3796_p10 = scmp.ne.s32.totalorder %s2658_s30, %s3795_s17  ;;  %p3801_p12 = scmp.lt.s32.totalorder %s3795_s17, %s3795_s17 }
 0x4bd   :  { %2635 = vst.msk [vmem:[#allocation7 + $0x78] sm:$0xff] %vm101_vm0, %v2619_v32 }
 0x4be   :  { %p3802_p13 = por %p3801_p12, %p3800_p11 }
 0x4c0   :  { %p3803_p0 = pnand %p3802_p13, %p3796_p10 }
 0x4c2   :  { %3806 = shalt.err (!%p3803_p0)
}
 0x4c3   :  { %s3807_s28 = scalar_lea.hbm %s4516_s13, 2048 }
 0x4c4   :  { %p3808_p1 = scmp.ne.s32.totalorder %s4516_s13, %s3807_s28  ;;  %p3811_p2 = scmp.lt.u32.totalorder %s3807_s28, %s4516_s13 }
 0x4c6   :  { %p3813_p3 = pnand %p3811_p2, %p3808_p1 }
 0x4c8   :  { %3816 = shalt.err (!%p3813_p3)
}
 0x4c9   :  { %2663 = dma.vmem_to_hbm [thread:$0]  %s2658_s30, 2048, %s4516_s13, [#allocation4], %s3826_s23, %s3826_s23, %s3827_s24  }
 0x4ca   :  { %3821 = dma.done.wait [#allocation4], 2048  }
 0x4cb   :  { %3822 = vsyncadd [#allocation4], 4294965248 }
 0x4cc   :  { %3823 = dma.done.wait [#allocation9], 2048  }
 0x4cd   :  { %3824 = vsyncadd [#allocation9], 4294965248 }
 0x4ce   :  { %2682 = vsyncpa [#allocation3], 1 }
 0x4cf   :  { %2683 = vsyncpa [#allocation6], 1 }
 0x4d0   :  { %2684 = vsyncpa [#allocation4], 1 }
 0x4d1   :  { %2685 = vsyncpa [#allocation9], 1 }

</bundles_post_ra>
